<compile_context>
chip_gen: v5e
topology: v5e:2x2
jax: 0.10.0
libtpu: 0.0.40
codegen_flags: <defaults>
</compile_context>

<pallas_src>
import jax
import jax.numpy as jnp
from jax import lax
from jax.experimental import pallas as pl
from jax.experimental.pallas import tpu as pltpu

_VMEM_LIMIT = 32 * 1024 * 1024  # safe scoped-VMEM request on v5e/v6e/v7x (<= 64 MiB phys)


# ---------------------------------------------------------------------------
# Pallas kernels
# ---------------------------------------------------------------------------
def _conv_pool_relu_kernel(cols_ref, w_ref, b_ref, o_ref, acc_ref):
    """y = relu(maxpool2x2(cols @ w + b)).

    Rows of `cols` are pre-ordered so that every group of 4 consecutive rows is one
    2x2 pool window; pooling = max over stride-4 row slices of the f32 accumulator.
    """
    acc_ref[...] = (
        jnp.dot(cols_ref[...], w_ref[...], preferred_element_type=jnp.float32)
        + b_ref[...])
    q = o_ref.shape[0]                               # pooled pixels in this tile
    p00 = acc_ref[pl.ds(0, q, stride=4), :]
    p01 = acc_ref[pl.ds(1, q, stride=4), :]
    p10 = acc_ref[pl.ds(2, q, stride=4), :]
    p11 = acc_ref[pl.ds(3, q, stride=4), :]
    m = jnp.maximum(jnp.maximum(p00, p01), jnp.maximum(p10, p11))
    o_ref[...] = jnp.maximum(m, 0.0).astype(o_ref.dtype)


def conv_pool_relu(cols, w, b, *, out_dtype=jnp.bfloat16, cap_rows=4096):
    """cols:(M,K) bf16 (M = 4*pooled_pixels, pool-grouped rows), w:(K,Cout) bf16,
    b:(1,Cout) f32  ->  (M//4, Cout) = relu(maxpool2x2(conv)) in pooled-NHWC row order."""
    M, K = cols.shape
    _, cout = w.shape
    if M <= cap_rows:
        tm = M                                     # single tile, full rows
    else:
        tm = (cap_rows // 32) * 32                 # multiple of 32: pool groups + sublanes
    return pl.pallas_call(
        _conv_pool_relu_kernel,
        out_shape=jax.ShapeDtypeStruct((M // 4, cout), out_dtype),
        grid=(pl.cdiv(M, tm),),
        in_specs=[
            pl.BlockSpec((tm, K), lambda i: (i, 0)),     # streamed row tiles
            pl.BlockSpec((K, cout), lambda i: (0, 0)),   # weights resident in VMEM
            pl.BlockSpec((1, cout), lambda i: (0, 0)),   # bias resident in VMEM
        ],
        out_specs=pl.BlockSpec((tm // 4, cout), lambda i: (i, 0)),
        scratch_shapes=[pltpu.VMEM((tm, cout), jnp.float32)],
        compiler_params=pltpu.CompilerParams(
            dimension_semantics=("parallel",),
            vmem_limit_bytes=_VMEM_LIMIT),
    )(cols, w, b)


def _mlp_head_kernel(x_ref, w1_ref, b1_ref, w2_ref, b2_ref, o_ref):
    # fc1 + ReLU (f32 accumulate / f32 elementwise)
    h = jnp.dot(x_ref[...], w1_ref[...], preferred_element_type=jnp.float32)
    h = jnp.maximum(h + b1_ref[...], 0.0)
    # fc2
    logits = jnp.dot(h.astype(w2_ref.dtype), w2_ref[...],
                     preferred_element_type=jnp.float32) + b2_ref[...]
    # numerically-stable log_softmax over the class dim (f32)
    m = jnp.max(logits, axis=-1, keepdims=True)
    s = logits - m
    lse = jnp.log(jnp.sum(jnp.exp(s), axis=-1, keepdims=True))
    o_ref[...] = (s - lse).astype(o_ref.dtype)


def mlp_head_log_softmax(x, w1, b1, w2, b2, *, cap_rows=2048):
    """Fused fc1 + ReLU + fc2 + log_softmax. x:(M,320) bf16 -> (M,10) f32."""
    M, K1 = x.shape
    _, H = w1.shape
    _, C = w2.shape
    tb = M if M <= cap_rows else cap_rows
    return pl.pallas_call(
        _mlp_head_kernel,
        out_shape=jax.ShapeDtypeStruct((M, C), jnp.float32),
        grid=(pl.cdiv(M, tb),),
        in_specs=[
            pl.BlockSpec((tb, K1), lambda i: (i, 0)),
            pl.BlockSpec((K1, H), lambda i: (0, 0)),
            pl.BlockSpec((1, H), lambda i: (0, 0)),
            pl.BlockSpec((H, C), lambda i: (0, 0)),
            pl.BlockSpec((1, C), lambda i: (0, 0)),
        ],
        out_specs=pl.BlockSpec((tb, C), lambda i: (i, 0)),
        compiler_params=pltpu.CompilerParams(
            dimension_semantics=("parallel",),
            vmem_limit_bytes=_VMEM_LIMIT),
    )(x, w1, b1, w2, b2)


# ---------------------------------------------------------------------------
# JAX glue
# ---------------------------------------------------------------------------
def _im2col_pool_ordered(x, kh, kw):
    """x:(N,H,W,C) -> (N*Hp*Wp*4, C*kh*kw).

    Row order (n, hp, wp, a, b) with (ho, wo) = (2hp+a, 2wp+b): every 4 consecutive
    rows form one 2x2 pool window.  Column order (C, kh, kw) matches PyTorch's
    weight.reshape(Cout, Cin*kh*kw).  Built from strided slices + stack(axis=-1):
    a single XLA gather/copy fusion, no separate transpose pass.
    """
    # TODO(synk): the im2col buffer is still materialized once in HBM by XLA; folding the
    # 25-tap shift-accumulate into the conv kernel would remove even that expansion.
    N, H, W, C = x.shape
    Ho, Wo = H - kh + 1, W - kw + 1
    Hp, Wp = Ho // 2, Wo // 2
    a_blocks = []
    for a in (0, 1):
        b_blocks = []
        for b in (0, 1):
            taps = [x[:, a + i: a + i + 2 * Hp: 2, b + j: b + j + 2 * Wp: 2, :]
                    for i in range(kh) for j in range(kw)]          # each (N,Hp,Wp,C)
            cols_b = jnp.stack(taps, axis=-1)                       # (N,Hp,Wp,C,kh*kw)
            b_blocks.append(cols_b.reshape(N, Hp, Wp, C * kh * kw))
        a_blocks.append(jnp.stack(b_blocks, axis=3))                # (N,Hp,Wp,2,C*kh*kw)
    cols = jnp.stack(a_blocks, axis=3)                              # (N,Hp,Wp,2,2,C*kh*kw)
    return cols.reshape(N * Hp * Wp * 4, C * kh * kw), (N, Hp, Wp)


def conv5x5_pool_relu(x_nhwc, wmat, b):
    """relu(maxpool2d(conv2d(x), 2)) with 5x5 VALID conv, stride 1, NHWC activations.
    Returns ((N*Hp*Wp, Cout) bf16 in (n, hp, wp) row order, (N, Hp, Wp))."""
    cols, (N, Hp, Wp) = _im2col_pool_ordered(x_nhwc, 5, 5)
    y = conv_pool_relu(cols, wmat, b)
    return y, (N, Hp, Wp)


# ---------------------------------------------------------------------------
# Model
# ---------------------------------------------------------------------------
def init_params(key):
    ks = jax.random.split(key, 8)
    return {
        "conv1_w": 0.1 * jax.random.normal(ks[0], (10, 1, 5, 5), jnp.float32),
        "conv1_b": 0.1 * jax.random.normal(ks[1], (10,), jnp.float32),
        "conv2_w": 0.1 * jax.random.normal(ks[2], (20, 10, 5, 5), jnp.float32),
        "conv2_b": 0.1 * jax.random.normal(ks[3], (20,), jnp.float32),
        "fc1_w": 0.1 * jax.random.normal(ks[4], (50, 320), jnp.float32),
        "fc1_b": 0.1 * jax.random.normal(ks[5], (50,), jnp.float32),
        "fc2_w": 0.1 * jax.random.normal(ks[6], (10, 50), jnp.float32),
        "fc2_b": 0.1 * jax.random.normal(ks[7], (10,), jnp.float32),
    }


def prepare_params(p):
    """One-time re-layout: matmul-ready weights (pre-transposed, bf16, NHWC column order)."""
    return {
        "c1_w": p["conv1_w"].reshape(10, 1 * 5 * 5).T.astype(jnp.bfloat16),   # (25, 10)
        "c1_b": p["conv1_b"].reshape(1, 10).astype(jnp.float32),
        "c2_w": p["conv2_w"].reshape(20, 10 * 5 * 5).T.astype(jnp.bfloat16),  # (250, 20)
        "c2_b": p["conv2_b"].reshape(1, 20).astype(jnp.float32),
        # fc1 input columns permuted from PyTorch's NCHW flatten (c,h,w) to NHWC (h,w,c)
        "fc1_w": p["fc1_w"].reshape(50, 20, 4, 4).transpose(2, 3, 1, 0)
                           .reshape(320, 50).astype(jnp.bfloat16),            # (320, 50)
        "fc1_b": p["fc1_b"].reshape(1, 50).astype(jnp.float32),
        "fc2_w": p["fc2_w"].T.astype(jnp.bfloat16),                           # (50, 10)
        "fc2_b": p["fc2_b"].reshape(1, 10).astype(jnp.float32),
    }


def net_forward(kp, x):
    # x: (N, 1, 28, 28) NCHW (matching PyTorch). C == 1, so NHWC is a free reshape,
    # and we cast to bf16 BEFORE the im2col expansion.
    N = x.shape[0]
    x = x.reshape(N, 28, 28, 1).astype(jnp.bfloat16)               # (N, 28, 28, 1)

    # conv1 + maxpool2x2 + relu (fused epilogue)
    y, (_, Hp1, Wp1) = conv5x5_pool_relu(x, kp["c1_w"], kp["c1_b"])  # (N*144, 10) bf16
    y = y.reshape(N, Hp1, Wp1, 10)                                   # free, NHWC

    # TODO(synk): Dropout2d / F.dropout implemented in eval mode (identity);
    # training-mode stochastic masks are not reproduced here.

    # conv2 + maxpool2x2 + relu (fused epilogue)
    y, (_, Hp2, Wp2) = conv5x5_pool_relu(y, kp["c2_w"], kp["c2_b"])  # (N*16, 20) bf16
    y = y.reshape(N, Hp2 * Wp2 * 20)                                 # (N, 320) NHWC-flat

    # Fused fc1 + ReLU + fc2 + log_softmax (dropout before fc2 is eval-mode identity).
    return mlp_head_log_softmax(y, kp["fc1_w"], kp["fc1_b"],
                                kp["fc2_w"], kp["fc2_b"])            # (N, 10) f32


# ---------------------------------------------------------------------------
# Pure-JAX f32 reference (mirrors the PyTorch forward in eval mode)
# ---------------------------------------------------------------------------
def reference_forward(p, x):
    def conv(x, w, b):
        y = lax.conv_general_dilated(x, w, (1, 1), "VALID",
                                     dimension_numbers=("NCHW", "OIHW", "NCHW"))
        return y + b[None, :, None, None]

    def pool_relu(y):
        n, c, h, w = y.shape
        y = jnp.max(y.reshape(n, c, h // 2, 2, w // 2, 2), axis=(3, 5))
        return jnp.maximum(y, 0.0)

    y = pool_relu(conv(x, p["conv1_w"], p["conv1_b"]))
    y = pool_relu(conv(y, p["conv2_w"], p["conv2_b"]))
    y = y.reshape(y.shape[0], -1)
    y = jnp.maximum(y @ p["fc1_w"].T + p["fc1_b"], 0.0)
    logits = y @ p["fc2_w"].T + p["fc2_b"]
    return jax.nn.log_softmax(logits, axis=1)


if __name__ == "__main__":
    key = jax.random.PRNGKey(0)
    pkey, xkey = jax.random.split(key)
    params = init_params(pkey)
    kparams = prepare_params(params)
    # fc1 expects 320 = 20*4*4 features -> input spatial size must be 28x28
    x = jax.random.normal(xkey, (2, 1, 28, 28), jnp.float32)

    fwd = jax.jit(net_forward)
    out = jax.block_until_ready(fwd(kparams, x))
    assert out.shape == (2, 10)
    # log_softmax rows should exponentiate-sum to 1
    assert bool(jnp.allclose(jnp.sum(jnp.exp(out), axis=1), 1.0, atol=1e-3))
    # compare against the f32 JAX reference (bf16 weights/activations -> loose tolerance)
    ref = jax.block_until_ready(jax.jit(reference_forward)(params, x))
    max_err = float(jnp.max(jnp.abs(out - ref)))
    assert max_err < 0.25, f"max |pallas - reference| = {max_err}"
    print("KERNEL_OK")
</pallas_src>

<mosaic_0001>
module attributes {stable_mosaic.version = 11 : i64} {
  func.func @_conv_pool_relu_kernel(%arg0: i32, %arg1: memref<1152x25xbf16, #tpu.memory_space<vmem>>, %arg2: memref<25x10xbf16, #tpu.memory_space<vmem>>, %arg3: memref<1x10xf32, #tpu.memory_space<vmem>>, %arg4: memref<288x10xbf16, #tpu.memory_space<vmem>>, %arg5: memref<1152x10xf32, #tpu.memory_space<vmem>>) attributes {dimension_semantics = [#tpu.dimension_semantics<parallel>], iteration_bounds = array<i64: 1>, scalar_prefetch = 0 : i64, scratch_operands = 1 : i64, tpu.core_type = #tpu.core_type<tc>, window_params = [{transform_indices = @transform_0, window_bounds = array<i64: 1152, 25>}, {pipeline_mode = #tpu.pipeline_mode<synchronous>, transform_indices = @transform_1, window_bounds = array<i64: 25, 10>}, {pipeline_mode = #tpu.pipeline_mode<synchronous>, transform_indices = @transform_2, window_bounds = array<i64: 1, 10>}, {transform_indices = @transform_3, window_bounds = array<i64: 288, 10>}]} {
    %c0 = arith.constant 0 : index
    %c0_0 = arith.constant 0 : index
    %0 = vector.load %arg1[%c0, %c0_0] : memref<1152x25xbf16, #tpu.memory_space<vmem>>, vector<1152x25xbf16>
    %c0_1 = arith.constant 0 : index
    %c0_2 = arith.constant 0 : index
    %1 = vector.load %arg2[%c0_1, %c0_2] : memref<25x10xbf16, #tpu.memory_space<vmem>>, vector<25x10xbf16>
    %cst = arith.constant dense<0.000000e+00> : vector<1152x10xf32>
    %2 = tpu.matmul %0, %1, %cst {dimension_numbers = #tpu.dot_dimension_numbers<[1], [0], [0], [1], [0, 0, 1, 1], [], []>} : vector<1152x25xbf16>, vector<25x10xbf16>, vector<1152x10xf32> -> vector<1152x10xf32>
    %c0_3 = arith.constant 0 : index
    %c0_4 = arith.constant 0 : index
    %3 = vector.load %arg3[%c0_3, %c0_4] : memref<1x10xf32, #tpu.memory_space<vmem>>, vector<1x10xf32>
    %4 = vector.broadcast %3 : vector<1x10xf32> to vector<1152x10xf32>
    %5 = arith.addf %2, %4 : vector<1152x10xf32>
    %c0_5 = arith.constant 0 : index
    %c0_6 = arith.constant 0 : index
    %6 = vector.load %arg5[%c0_5, %c0_6] : memref<1152x10xf32, #tpu.memory_space<vmem>>, vector<1152x10xf32>
    tpu.vector_store %arg5[%c0_5, %c0_6], %5 {strides = array<i32>} : memref<1152x10xf32, #tpu.memory_space<vmem>>, vector<1152x10xf32>,
    %c0_7 = arith.constant 0 : index
    %c0_8 = arith.constant 0 : index
    %7 = tpu.strided_load %arg5[%c0_7, %c0_8] {strides = array<i32: 4, 1>} : memref<1152x10xf32, #tpu.memory_space<vmem>>, vector<288x10xf32>
    %c1 = arith.constant 1 : index
    %c0_9 = arith.constant 0 : index
    %8 = tpu.strided_load %arg5[%c1, %c0_9] {strides = array<i32: 4, 1>} : memref<1152x10xf32, #tpu.memory_space<vmem>>, vector<288x10xf32>
    %c2 = arith.constant 2 : index
    %c0_10 = arith.constant 0 : index
    %9 = tpu.strided_load %arg5[%c2, %c0_10] {strides = array<i32: 4, 1>} : memref<1152x10xf32, #tpu.memory_space<vmem>>, vector<288x10xf32>
    %c3 = arith.constant 3 : index
    %c0_11 = arith.constant 0 : index
    %10 = tpu.strided_load %arg5[%c3, %c0_11] {strides = array<i32: 4, 1>} : memref<1152x10xf32, #tpu.memory_space<vmem>>, vector<288x10xf32>
    %11 = arith.maximumf %7, %8 : vector<288x10xf32>
    %12 = arith.maximumf %9, %10 : vector<288x10xf32>
    %13 = arith.maximumf %11, %12 : vector<288x10xf32>
    %cst_12 = arith.constant 0.000000e+00 : f32
    %14 = vector.broadcast %cst_12 : f32 to vector<288x10xf32>
    %15 = arith.maximumf %13, %14 : vector<288x10xf32>
    %16 = arith.truncf %15 : vector<288x10xf32> to vector<288x10xbf16>
    %c0_13 = arith.constant 0 : index
    %c0_14 = arith.constant 0 : index
    %17 = vector.load %arg4[%c0_13, %c0_14] : memref<288x10xbf16, #tpu.memory_space<vmem>>, vector<288x10xbf16>
    tpu.vector_store %arg4[%c0_13, %c0_14], %16 {strides = array<i32>} : memref<288x10xbf16, #tpu.memory_space<vmem>>, vector<288x10xbf16>,
    return
  }
  func.func @transform_0(%arg0: i32) -> (i32, i32) {
    %c0_i32 = arith.constant 0 : i32
    %c0_i32_0 = arith.constant 0 : i32
    return %arg0, %c0_i32 : i32, i32
  }
  func.func @transform_1(%arg0: i32) -> (i32, i32) {
    %c0_i32 = arith.constant 0 : i32
    %c0_i32_0 = arith.constant 0 : i32
    %c0_i32_1 = arith.constant 0 : i32
    return %c0_i32, %c0_i32_0 : i32, i32
  }
  func.func @transform_2(%arg0: i32) -> (i32, i32) {
    %c0_i32 = arith.constant 0 : i32
    %c0_i32_0 = arith.constant 0 : i32
    %c0_i32_1 = arith.constant 0 : i32
    return %c0_i32, %c0_i32_0 : i32, i32
  }
  func.func @transform_3(%arg0: i32) -> (i32, i32) {
    %c0_i32 = arith.constant 0 : i32
    %c0_i32_0 = arith.constant 0 : i32
    return %arg0, %c0_i32 : i32, i32
  }
}

module attributes {stable_mosaic.version = 11 : i64} {
  func.func @_conv_pool_relu_kernel(%arg0: i32, %arg1: memref<128x250xbf16, #tpu.memory_space<vmem>>, %arg2: memref<250x20xbf16, #tpu.memory_space<vmem>>, %arg3: memref<1x20xf32, #tpu.memory_space<vmem>>, %arg4: memref<32x20xbf16, #tpu.memory_space<vmem>>, %arg5: memref<128x20xf32, #tpu.memory_space<vmem>>) attributes {dimension_semantics = [#tpu.dimension_semantics<parallel>], iteration_bounds = array<i64: 1>, scalar_prefetch = 0 : i64, scratch_operands = 1 : i64, tpu.core_type = #tpu.core_type<tc>, window_params = [{transform_indices = @transform_0, window_bounds = array<i64: 128, 250>}, {pipeline_mode = #tpu.pipeline_mode<synchronous>, transform_indices = @transform_1, window_bounds = array<i64: 250, 20>}, {pipeline_mode = #tpu.pipeline_mode<synchronous>, transform_indices = @transform_2, window_bounds = array<i64: 1, 20>}, {transform_indices = @transform_3, window_bounds = array<i64: 32, 20>}]} {
    %c0 = arith.constant 0 : index
    %c0_0 = arith.constant 0 : index
    %0 = vector.load %arg1[%c0, %c0_0] : memref<128x250xbf16, #tpu.memory_space<vmem>>, vector<128x250xbf16>
    %c0_1 = arith.constant 0 : index
    %c0_2 = arith.constant 0 : index
    %1 = vector.load %arg2[%c0_1, %c0_2] : memref<250x20xbf16, #tpu.memory_space<vmem>>, vector<250x20xbf16>
    %cst = arith.constant dense<0.000000e+00> : vector<128x20xf32>
    %2 = tpu.matmul %0, %1, %cst {dimension_numbers = #tpu.dot_dimension_numbers<[1], [0], [0], [1], [0, 0, 1, 1], [], []>} : vector<128x250xbf16>, vector<250x20xbf16>, vector<128x20xf32> -> vector<128x20xf32>
    %c0_3 = arith.constant 0 : index
    %c0_4 = arith.constant 0 : index
    %3 = vector.load %arg3[%c0_3, %c0_4] : memref<1x20xf32, #tpu.memory_space<vmem>>, vector<1x20xf32>
    %4 = vector.broadcast %3 : vector<1x20xf32> to vector<128x20xf32>
    %5 = arith.addf %2, %4 : vector<128x20xf32>
    %c0_5 = arith.constant 0 : index
    %c0_6 = arith.constant 0 : index
    %6 = vector.load %arg5[%c0_5, %c0_6] : memref<128x20xf32, #tpu.memory_space<vmem>>, vector<128x20xf32>
    tpu.vector_store %arg5[%c0_5, %c0_6], %5 {strides = array<i32>} : memref<128x20xf32, #tpu.memory_space<vmem>>, vector<128x20xf32>,
    %c0_7 = arith.constant 0 : index
    %c0_8 = arith.constant 0 : index
    %7 = tpu.strided_load %arg5[%c0_7, %c0_8] {strides = array<i32: 4, 1>} : memref<128x20xf32, #tpu.memory_space<vmem>>, vector<32x20xf32>
    %c1 = arith.constant 1 : index
    %c0_9 = arith.constant 0 : index
    %8 = tpu.strided_load %arg5[%c1, %c0_9] {strides = array<i32: 4, 1>} : memref<128x20xf32, #tpu.memory_space<vmem>>, vector<32x20xf32>
    %c2 = arith.constant 2 : index
    %c0_10 = arith.constant 0 : index
    %9 = tpu.strided_load %arg5[%c2, %c0_10] {strides = array<i32: 4, 1>} : memref<128x20xf32, #tpu.memory_space<vmem>>, vector<32x20xf32>
    %c3 = arith.constant 3 : index
    %c0_11 = arith.constant 0 : index
    %10 = tpu.strided_load %arg5[%c3, %c0_11] {strides = array<i32: 4, 1>} : memref<128x20xf32, #tpu.memory_space<vmem>>, vector<32x20xf32>
    %11 = arith.maximumf %7, %8 : vector<32x20xf32>
    %12 = arith.maximumf %9, %10 : vector<32x20xf32>
    %13 = arith.maximumf %11, %12 : vector<32x20xf32>
    %cst_12 = arith.constant 0.000000e+00 : f32
    %14 = vector.broadcast %cst_12 : f32 to vector<32x20xf32>
    %15 = arith.maximumf %13, %14 : vector<32x20xf32>
    %16 = arith.truncf %15 : vector<32x20xf32> to vector<32x20xbf16>
    %c0_13 = arith.constant 0 : index
    %c0_14 = arith.constant 0 : index
    %17 = vector.load %arg4[%c0_13, %c0_14] : memref<32x20xbf16, #tpu.memory_space<vmem>>, vector<32x20xbf16>
    tpu.vector_store %arg4[%c0_13, %c0_14], %16 {strides = array<i32>} : memref<32x20xbf16, #tpu.memory_space<vmem>>, vector<32x20xbf16>,
    return
  }
  func.func @transform_0(%arg0: i32) -> (i32, i32) {
    %c0_i32 = arith.constant 0 : i32
    %c0_i32_0 = arith.constant 0 : i32
    return %arg0, %c0_i32 : i32, i32
  }
  func.func @transform_1(%arg0: i32) -> (i32, i32) {
    %c0_i32 = arith.constant 0 : i32
    %c0_i32_0 = arith.constant 0 : i32
    %c0_i32_1 = arith.constant 0 : i32
    return %c0_i32, %c0_i32_0 : i32, i32
  }
  func.func @transform_2(%arg0: i32) -> (i32, i32) {
    %c0_i32 = arith.constant 0 : i32
    %c0_i32_0 = arith.constant 0 : i32
    %c0_i32_1 = arith.constant 0 : i32
    return %c0_i32, %c0_i32_0 : i32, i32
  }
  func.func @transform_3(%arg0: i32) -> (i32, i32) {
    %c0_i32 = arith.constant 0 : i32
    %c0_i32_0 = arith.constant 0 : i32
    return %arg0, %c0_i32 : i32, i32
  }
}

module attributes {stable_mosaic.version = 11 : i64} {
  func.func @_mlp_head_kernel(%arg0: i32, %arg1: memref<2x320xbf16, #tpu.memory_space<vmem>>, %arg2: memref<320x50xbf16, #tpu.memory_space<vmem>>, %arg3: memref<1x50xf32, #tpu.memory_space<vmem>>, %arg4: memref<50x10xbf16, #tpu.memory_space<vmem>>, %arg5: memref<1x10xf32, #tpu.memory_space<vmem>>, %arg6: memref<2x10xf32, #tpu.memory_space<vmem>>) attributes {dimension_semantics = [#tpu.dimension_semantics<parallel>], iteration_bounds = array<i64: 1>, scalar_prefetch = 0 : i64, scratch_operands = 0 : i64, tpu.core_type = #tpu.core_type<tc>, window_params = [{transform_indices = @transform_0, window_bounds = array<i64: 2, 320>}, {pipeline_mode = #tpu.pipeline_mode<synchronous>, transform_indices = @transform_1, window_bounds = array<i64: 320, 50>}, {pipeline_mode = #tpu.pipeline_mode<synchronous>, transform_indices = @transform_2, window_bounds = array<i64: 1, 50>}, {pipeline_mode = #tpu.pipeline_mode<synchronous>, transform_indices = @transform_3, window_bounds = array<i64: 50, 10>}, {pipeline_mode = #tpu.pipeline_mode<synchronous>, transform_indices = @transform_4, window_bounds = array<i64: 1, 10>}, {transform_indices = @transform_5, window_bounds = array<i64: 2, 10>}]} {
    %c0 = arith.constant 0 : index
    %c0_0 = arith.constant 0 : index
    %0 = vector.load %arg1[%c0, %c0_0] : memref<2x320xbf16, #tpu.memory_space<vmem>>, vector<2x320xbf16>
    %c0_1 = arith.constant 0 : index
    %c0_2 = arith.constant 0 : index
    %1 = vector.load %arg2[%c0_1, %c0_2] : memref<320x50xbf16, #tpu.memory_space<vmem>>, vector<320x50xbf16>
    %cst = arith.constant dense<0.000000e+00> : vector<2x50xf32>
    %2 = tpu.matmul %0, %1, %cst {dimension_numbers = #tpu.dot_dimension_numbers<[1], [0], [0], [1], [0, 0, 1, 1], [], []>} : vector<2x320xbf16>, vector<320x50xbf16>, vector<2x50xf32> -> vector<2x50xf32>
    %c0_3 = arith.constant 0 : index
    %c0_4 = arith.constant 0 : index
    %3 = vector.load %arg3[%c0_3, %c0_4] : memref<1x50xf32, #tpu.memory_space<vmem>>, vector<1x50xf32>
    %4 = vector.broadcast %3 : vector<1x50xf32> to vector<2x50xf32>
    %5 = arith.addf %2, %4 : vector<2x50xf32>
    %cst_5 = arith.constant 0.000000e+00 : f32
    %6 = vector.broadcast %cst_5 : f32 to vector<2x50xf32>
    %7 = arith.maximumf %5, %6 : vector<2x50xf32>
    %8 = arith.truncf %7 : vector<2x50xf32> to vector<2x50xbf16>
    %c0_6 = arith.constant 0 : index
    %c0_7 = arith.constant 0 : index
    %9 = vector.load %arg4[%c0_6, %c0_7] : memref<50x10xbf16, #tpu.memory_space<vmem>>, vector<50x10xbf16>
    %cst_8 = arith.constant dense<0.000000e+00> : vector<2x10xf32>
    %10 = tpu.matmul %8, %9, %cst_8 {dimension_numbers = #tpu.dot_dimension_numbers<[1], [0], [0], [1], [0, 0, 1, 1], [], []>} : vector<2x50xbf16>, vector<50x10xbf16>, vector<2x10xf32> -> vector<2x10xf32>
    %c0_9 = arith.constant 0 : index
    %c0_10 = arith.constant 0 : index
    %11 = vector.load %arg5[%c0_9, %c0_10] : memref<1x10xf32, #tpu.memory_space<vmem>>, vector<1x10xf32>
    %12 = vector.broadcast %11 : vector<1x10xf32> to vector<2x10xf32>
    %13 = arith.addf %10, %12 : vector<2x10xf32>
    %cst_11 = arith.constant dense<0xFF800000> : vector<2xf32>
    %14 = vector.multi_reduction <maximumf>, %13, %cst_11 [1] : vector<2x10xf32> to vector<2xf32>
    %15 = vector.shape_cast %14 : vector<2xf32> to vector<2x1xf32>
    %16 = vector.broadcast %15 : vector<2x1xf32> to vector<2x10xf32>
    %17 = arith.subf %13, %16 : vector<2x10xf32>
    %18 = math.exp %17 : vector<2x10xf32>
    %cst_12 = arith.constant dense<0.000000e+00> : vector<2xf32>
    %19 = vector.multi_reduction <add>, %18, %cst_12 [1] : vector<2x10xf32> to vector<2xf32>
    %20 = vector.shape_cast %19 : vector<2xf32> to vector<2x1xf32>
    %21 = math.log %20 : vector<2x1xf32>
    %22 = vector.broadcast %21 : vector<2x1xf32> to vector<2x10xf32>
    %23 = arith.subf %17, %22 : vector<2x10xf32>
    %c0_13 = arith.constant 0 : index
    %c0_14 = arith.constant 0 : index
    %24 = vector.load %arg6[%c0_13, %c0_14] : memref<2x10xf32, #tpu.memory_space<vmem>>, vector<2x10xf32>
    tpu.vector_store %arg6[%c0_13, %c0_14], %23 {strides = array<i32>} : memref<2x10xf32, #tpu.memory_space<vmem>>, vector<2x10xf32>,
    return
  }
  func.func @transform_0(%arg0: i32) -> (i32, i32) {
    %c0_i32 = arith.constant 0 : i32
    %c0_i32_0 = arith.constant 0 : i32
    return %arg0, %c0_i32 : i32, i32
  }
  func.func @transform_1(%arg0: i32) -> (i32, i32) {
    %c0_i32 = arith.constant 0 : i32
    %c0_i32_0 = arith.constant 0 : i32
    %c0_i32_1 = arith.constant 0 : i32
    return %c0_i32, %c0_i32_0 : i32, i32
  }
  func.func @transform_2(%arg0: i32) -> (i32, i32) {
    %c0_i32 = arith.constant 0 : i32
    %c0_i32_0 = arith.constant 0 : i32
    %c0_i32_1 = arith.constant 0 : i32
    return %c0_i32, %c0_i32_0 : i32, i32
  }
  func.func @transform_3(%arg0: i32) -> (i32, i32) {
    %c0_i32 = arith.constant 0 : i32
    %c0_i32_0 = arith.constant 0 : i32
    %c0_i32_1 = arith.constant 0 : i32
    return %c0_i32, %c0_i32_0 : i32, i32
  }
  func.func @transform_4(%arg0: i32) -> (i32, i32) {
    %c0_i32 = arith.constant 0 : i32
    %c0_i32_0 = arith.constant 0 : i32
    %c0_i32_1 = arith.constant 0 : i32
    return %c0_i32, %c0_i32_0 : i32, i32
  }
  func.func @transform_5(%arg0: i32) -> (i32, i32) {
    %c0_i32 = arith.constant 0 : i32
    %c0_i32_0 = arith.constant 0 : i32
    return %arg0, %c0_i32 : i32, i32
  }
}

</mosaic_0001>

<bundles_post_ra>
// kernel: net_forward.3
= control target key start
LH: loop header
LB: loop body
LE: loop exit
PB: predicated region body
PF: predicated region fallthrough
CT: control target
= control target key end

     0   :  { %vm755_vm0 = vcmask 1043456   ;;  %vm756_vm1 = vcmask 1044480   ;;  %v2235_v2 = vmov 65535   ;;  %vm538_vm2 = vcmask 203776   ;;  %s2995_s1 = inlined_call_operand.vmem [shape: bf16[25,10], index: 1, kind: input, shape index: {}]   ;;  %s2996_s2 = inlined_call_operand.vmem [shape: f32[1,10], index: 2, kind: input, shape index: {}]   ;;  %s2997_s0 = inlined_call_operand.vmem [shape: bf16[1152,25], index: 0, kind: input, shape index: {}]   ;;  %s2998_s3 = inlined_call_operand.vmem [shape: bf16[288,10], index: 3, kind: output, shape index: {}]  }
   0x1   :  { %v2078_v0 = vld [vmem:[%s2995_s1 + $0x8] sm:$0xf]  ;;  %v2225_v1 = vld [vmem:[%s2995_s1 + $0x8] sm:$0x10]  ;;  %v757_v3 = vsel %vm755_vm0, 4294967295, %v2235_v2  ;;  %v2224_v7 = vld [vmem:[%s2995_s1] sm:$0xff] }
   0x2   :  { %v2079_v4 = vor.u32 %v2225_v1, %v2078_v0  ;;  %v758_v5 = vsel %vm756_vm1, %v757_v3, 0  ;;  %v2152_v8 = vld [vmem:[%s2997_s0] sm:$0xff]  ;;  %v2170_v9 = vld [vmem:[%s2997_s0 + $0x90] sm:$0xff]  ;;  %v2153_v12 = vld [vmem:[%s2997_s0 + $0x8] sm:$0xff]  ;;  %vm1131_vm3 = vcmask 80896   ;;  %vm1743_vm4 = vcmask 76800  }
   0x3   :  { %v2188_v10 = vld [vmem:[%s2997_s0 + $0x120] sm:$0xff]  ;;  %v2206_v11 = vld [vmem:[%s2997_s0 + $0x1b0] sm:$0xff]  ;;  %v2171_v13 = vld [vmem:[%s2997_s0 + $0x98] sm:$0xff] }
   0x4   :  { %v760_v6 = vand.u32 %v2079_v4, %v758_v5  ;;  %v2189_v14 = vld [vmem:[%s2997_s0 + $0x128] sm:$0xff]  ;;  %v2207_v15 = vld [vmem:[%s2997_s0 + $0x1b8] sm:$0xff]  ;;  %v2154_v16 = vld [vmem:[%s2997_s0 + $0x10] sm:$0xff] }
   0x5   :  { %v2172_v17 = vld [vmem:[%s2997_s0 + $0xa0] sm:$0xff]  ;;  %v2190_v18 = vld [vmem:[%s2997_s0 + $0x130] sm:$0xff]  ;;  %v2155_v20 = vld [vmem:[%s2997_s0 + $0x18] sm:$0xff] }
   0x6   :  { %768 = vmatpush.bf16.msra.mxu0 %v760_v6  ;;  %2226 = vmatpush.bf16.msra.mxu1 %v760_v6  ;;  %v2208_v19 = vld [vmem:[%s2997_s0 + $0x1c0] sm:$0xff]  ;;  %v2173_v21 = vld [vmem:[%s2997_s0 + $0xa8] sm:$0xff]  ;;  %v2191_v22 = vld [vmem:[%s2997_s0 + $0x138] sm:$0xff] }
   0x7   :  { %2227 = vmatpush.bf16.msra.mxu2 %v760_v6  ;;  %2228 = vmatpush.bf16.msra.mxu3 %v760_v6  ;;  %v2209_v23 = vld [vmem:[%s2997_s0 + $0x1c8] sm:$0xff]  ;;  %v2156_v24 = vld [vmem:[%s2997_s0 + $0x20] sm:$0xff]  ;;  %v2174_v25 = vld [vmem:[%s2997_s0 + $0xb0] sm:$0xff] }
   0x8   :  { %v2192_v26 = vld [vmem:[%s2997_s0 + $0x140] sm:$0xff]  ;;  %v2210_v27 = vld [vmem:[%s2997_s0 + $0x1d0] sm:$0xff]  ;;  %v2157_v28 = vld [vmem:[%s2997_s0 + $0x28] sm:$0xff] }
   0x9   :  { %v2175_v29 = vld [vmem:[%s2997_s0 + $0xb8] sm:$0xff]  ;;  %v2193_v30 = vld [vmem:[%s2997_s0 + $0x148] sm:$0xff]  ;;  %v2158_v32 = vld [vmem:[%s2997_s0 + $0x30] sm:$0xff] }
   0xa   :  { %769 = vmatpush.bf16.msra.mxu0 %v2224_v7  ;;  %2229 = vmatpush.bf16.msra.mxu1 %v2224_v7  ;;  %v2211_v31 = vld [vmem:[%s2997_s0 + $0x1d8] sm:$0xff]  ;;  %v2176_v33 = vld [vmem:[%s2997_s0 + $0xc0] sm:$0xff]  ;;  %v2194_v34 = vld [vmem:[%s2997_s0 + $0x150] sm:$0xff] }
   0xb   :  { %2230 = vmatpush.bf16.msra.mxu2 %v2224_v7  ;;  %2231 = vmatpush.bf16.msra.mxu3 %v2224_v7  ;;  %v2212_v35 = vld [vmem:[%s2997_s0 + $0x1e0] sm:$0xff]  ;;  %v2159_v36 = vld [vmem:[%s2997_s0 + $0x38] sm:$0xff]  ;;  %v2177_v37 = vld [vmem:[%s2997_s0 + $0xc8] sm:$0xff] }
   0xc   :  { %v2195_v38 = vld [vmem:[%s2997_s0 + $0x158] sm:$0xff]  ;;  %v2213_v39 = vld [vmem:[%s2997_s0 + $0x1e8] sm:$0xff]  ;;  %v2396_v40 = vld [vmem:[%s2996_s2] ss:$0 sm:$0xff] }
   0xd   :  { %2080 = vmatmul.msk.bf16.vlgmr.msra.gmra.mxu0 %vm538_vm2, %v2152_v8  ;;  %2098 = vmatmul.msk.bf16.vlgmr.msra.gmra.mxu1 %vm538_vm2, %v2170_v9  ;;  %v2160_v41 = vld [vmem:[%s2997_s0 + $0x40] sm:$0xff]  ;;  %v2178_v42 = vld [vmem:[%s2997_s0 + $0xd0] sm:$0xff]  ;;  %v2161_v59 = vld [vmem:[%s2997_s0 + $0x48] sm:$0xff] }
   0xe   :  { %2116 = vmatmul.msk.bf16.vlgmr.msra.gmra.mxu2 %vm538_vm2, %v2188_v10  ;;  %2134 = vmatmul.msk.bf16.vlgmr.msra.gmra.mxu3 %vm538_vm2, %v2206_v11  ;;  %v2196_v45 = vld [vmem:[%s2997_s0 + $0x160] sm:$0xff]  ;;  %v2214_v46 = vld [vmem:[%s2997_s0 + $0x1f0] sm:$0xff]  ;;  %v2179_v60 = vld [vmem:[%s2997_s0 + $0xd8] sm:$0xff] }
   0xf   :  { %v2197_v1 = vld [vmem:[%s2997_s0 + $0x168] sm:$0xff]  ;;  %v2215_v2 = vld [vmem:[%s2997_s0 + $0x1f8] sm:$0xff] }
  0x1d   :  { %2081 = vmatmul.msk.bf16.gmra.mxu0 %vm538_vm2, %v2153_v12  ;;  %2099 = vmatmul.msk.bf16.gmra.mxu1 %vm538_vm2, %v2171_v13 }
  0x1e   :  { %2117 = vmatmul.msk.bf16.gmra.mxu2 %vm538_vm2, %v2189_v14  ;;  %2135 = vmatmul.msk.bf16.gmra.mxu3 %vm538_vm2, %v2207_v15  ;;  %v2162_v15 = vld [vmem:[%s2997_s0 + $0x50] sm:$0xff] }
  0x2d   :  { %2082 = vmatmul.msk.bf16.gmra.mxu0 %vm538_vm2, %v2154_v16  ;;  %2100 = vmatmul.msk.bf16.gmra.mxu1 %vm538_vm2, %v2172_v17  ;;  %v2180_v16 = vld [vmem:[%s2997_s0 + $0xe0] sm:$0xff] }
  0x2e   :  { %2118 = vmatmul.msk.bf16.gmra.mxu2 %vm538_vm2, %v2190_v18  ;;  %2136 = vmatmul.msk.bf16.gmra.mxu3 %vm538_vm2, %v2208_v19 }
  0x3d   :  { %2083 = vmatmul.msk.bf16.gmra.mxu0 %vm538_vm2, %v2155_v20  ;;  %2101 = vmatmul.msk.bf16.gmra.mxu1 %vm538_vm2, %v2173_v21  ;;  %v2198_v20 = vld [vmem:[%s2997_s0 + $0x170] sm:$0xff]  ;;  %v2216_v21 = vld [vmem:[%s2997_s0 + $0x200] sm:$0xff] }
  0x3e   :  { %2119 = vmatmul.msk.bf16.gmra.mxu2 %vm538_vm2, %v2191_v22  ;;  %2137 = vmatmul.msk.bf16.gmra.mxu3 %vm538_vm2, %v2209_v23 }
  0x4d   :  { %2084 = vmatmul.msk.bf16.gmra.mxu0 %vm538_vm2, %v2156_v24  ;;  %2102 = vmatmul.msk.bf16.gmra.mxu1 %vm538_vm2, %v2174_v25 }
  0x4e   :  { %2120 = vmatmul.msk.bf16.gmra.mxu2 %vm538_vm2, %v2192_v26  ;;  %2138 = vmatmul.msk.bf16.gmra.mxu3 %vm538_vm2, %v2210_v27 }
  0x5d   :  { %2085 = vmatmul.msk.bf16.gmra.mxu0 %vm538_vm2, %v2157_v28  ;;  %2103 = vmatmul.msk.bf16.gmra.mxu1 %vm538_vm2, %v2175_v29 }
  0x5e   :  { %2121 = vmatmul.msk.bf16.gmra.mxu2 %vm538_vm2, %v2193_v30  ;;  %2139 = vmatmul.msk.bf16.gmra.mxu3 %vm538_vm2, %v2211_v31 }
  0x6d   :  { %2086 = vmatmul.msk.bf16.gmra.mxu0 %vm538_vm2, %v2158_v32  ;;  %2104 = vmatmul.msk.bf16.gmra.mxu1 %vm538_vm2, %v2176_v33 }
  0x6e   :  { %2122 = vmatmul.msk.bf16.gmra.mxu2 %vm538_vm2, %v2194_v34  ;;  %2140 = vmatmul.msk.bf16.gmra.mxu3 %vm538_vm2, %v2212_v35 }
  0x7d   :  { %2087 = vmatmul.msk.bf16.gmra.mxu0 %vm538_vm2, %v2159_v36  ;;  %2105 = vmatmul.msk.bf16.gmra.mxu1 %vm538_vm2, %v2177_v37 }
  0x7e   :  { %2123 = vmatmul.msk.bf16.gmra.mxu2 %vm538_vm2, %v2195_v38  ;;  %2141 = vmatmul.msk.bf16.gmra.mxu3 %vm538_vm2, %v2213_v39 }
  0x8a   :  { %v771_v43 = vpop.f32.mrf.mxu0  ;;  %v861_v44 = vpop.f32.mrf.mxu1 }
  0x8b   :  { %v772_v47 = vadd.f32 %v2396_v40, %v771_v43  ;;  %v862_v48 = vadd.f32 %v2396_v40, %v861_v44 }
  0x8d   :  { %1132 = vst.msk [vmem:[#allocation2] sm:$0xff] %vm1131_vm3, %v772_v47  ;;  %2088 = vmatmul.msk.bf16.gmra.mxu0 %vm538_vm2, %v2160_v41  ;;  %2106 = vmatmul.msk.bf16.gmra.mxu1 %vm538_vm2, %v2178_v42 }
  0x8e   :  { %1168 = vst.msk [vmem:[#allocation2 + $0x120] sm:$0xff] %vm1131_vm3, %v862_v48  ;;  %2124 = vmatmul.msk.bf16.gmra.mxu2 %vm538_vm2, %v2196_v45  ;;  %2142 = vmatmul.msk.bf16.gmra.mxu3 %vm538_vm2, %v2214_v46 }
  0x91   :  { %v951_v49 = vpop.f32.mrf.mxu2  ;;  %v1041_v50 = vpop.f32.mrf.mxu3 }
  0x92   :  { %v952_v51 = vadd.f32 %v2396_v40, %v951_v49  ;;  %v1042_v52 = vadd.f32 %v2396_v40, %v1041_v50  ;;  %v773_v53 = vpop.f32.mrf.mxu0  ;;  %v863_v54 = vpop.f32.mrf.mxu1 }
  0x93   :  { %v774_v55 = vadd.f32 %v2396_v40, %v773_v53  ;;  %v864_v56 = vadd.f32 %v2396_v40, %v863_v54 }
  0x94   :  { %1204 = vst.msk [vmem:[#allocation2 + $0x240] sm:$0xff] %vm1131_vm3, %v952_v51 }
  0x95   :  { %1240 = vst.msk [vmem:[#allocation2 + $0x360] sm:$0xff] %vm1131_vm3, %v1042_v52 }
  0x96   :  { %1133 = vst.msk [vmem:[#allocation2 + $0x8] sm:$0xff] %vm1131_vm3, %v774_v55 }
  0x97   :  { %1169 = vst.msk [vmem:[#allocation2 + $0x128] sm:$0xff] %vm1131_vm3, %v864_v56 }
  0x99   :  { %v953_v57 = vpop.f32.mrf.mxu2  ;;  %v1043_v58 = vpop.f32.mrf.mxu3 }
  0x9a   :  { %v954_v61 = vadd.f32 %v2396_v40, %v953_v57  ;;  %v1044_v62 = vadd.f32 %v2396_v40, %v1043_v58  ;;  %v776_v63 = vpop.f32.mrf.mxu0  ;;  %v866_v0 = vpop.f32.mrf.mxu1 }
  0x9b   :  { %v777_v3 = vadd.f32 %v2396_v40, %v776_v63  ;;  %v867_v4 = vadd.f32 %v2396_v40, %v866_v0 }
  0x9c   :  { %1205 = vst.msk [vmem:[#allocation2 + $0x248] sm:$0xff] %vm1131_vm3, %v954_v61 }
  0x9d   :  { %1241 = vst.msk [vmem:[#allocation2 + $0x368] sm:$0xff] %vm1131_vm3, %v1044_v62  ;;  %2089 = vmatmul.msk.bf16.gmra.mxu0 %vm538_vm2, %v2161_v59  ;;  %2107 = vmatmul.msk.bf16.gmra.mxu1 %vm538_vm2, %v2179_v60 }
  0x9e   :  { %1134 = vst.msk [vmem:[#allocation2 + $0x10] sm:$0xff] %vm1131_vm3, %v777_v3  ;;  %2125 = vmatmul.msk.bf16.gmra.mxu2 %vm538_vm2, %v2197_v1  ;;  %2143 = vmatmul.msk.bf16.gmra.mxu3 %vm538_vm2, %v2215_v2 }
  0x9f   :  { %1170 = vst.msk [vmem:[#allocation2 + $0x130] sm:$0xff] %vm1131_vm3, %v867_v4  ;;  %v2163_v4 = vld [vmem:[%s2997_s0 + $0x58] sm:$0xff] }
  0xa1   :  { %v956_v5 = vpop.f32.mrf.mxu2  ;;  %v1046_v6 = vpop.f32.mrf.mxu3 }
  0xa2   :  { %v957_v7 = vadd.f32 %v2396_v40, %v956_v5  ;;  %v1047_v8 = vadd.f32 %v2396_v40, %v1046_v6  ;;  %v778_v9 = vpop.f32.mrf.mxu0  ;;  %v868_v10 = vpop.f32.mrf.mxu1  ;;  %v2181_v5 = vld [vmem:[%s2997_s0 + $0xe8] sm:$0xff] }
  0xa3   :  { %v779_v11 = vadd.f32 %v2396_v40, %v778_v9  ;;  %v869_v12 = vadd.f32 %v2396_v40, %v868_v10 }
  0xa4   :  { %1206 = vst.msk [vmem:[#allocation2 + $0x250] sm:$0xff] %vm1131_vm3, %v957_v7 }
  0xa5   :  { %1242 = vst.msk [vmem:[#allocation2 + $0x370] sm:$0xff] %vm1131_vm3, %v1047_v8 }
  0xa6   :  { %1135 = vst.msk [vmem:[#allocation2 + $0x18] sm:$0xff] %vm1131_vm3, %v779_v11  ;;  %v2199_v11 = vld [vmem:[%s2997_s0 + $0x178] sm:$0xff] }
  0xa7   :  { %1171 = vst.msk [vmem:[#allocation2 + $0x138] sm:$0xff] %vm1131_vm3, %v869_v12  ;;  %v2217_v12 = vld [vmem:[%s2997_s0 + $0x208] sm:$0xff] }
  0xa9   :  { %v958_v13 = vpop.f32.mrf.mxu2  ;;  %v1048_v14 = vpop.f32.mrf.mxu3 }
  0xaa   :  { %v959_v17 = vadd.f32 %v2396_v40, %v958_v13  ;;  %v781_v18 = vpop.f32.mrf.mxu0  ;;  %v871_v19 = vpop.f32.mrf.mxu1  ;;  %v1049_v22 = vadd.f32 %v2396_v40, %v1048_v14 }
  0xab   :  { %v782_v23 = vadd.f32 %v2396_v40, %v781_v18  ;;  %v872_v27 = vadd.f32 %v2396_v40, %v871_v19 }
  0xac   :  { %1207 = vst.msk [vmem:[#allocation2 + $0x258] sm:$0xff] %vm1131_vm3, %v959_v17 }
  0xad   :  { %v1276_v24 = vld [vmem:[#allocation2] ss:$4 sm:$0xff]  ;;  %v1348_v25 = vld [vmem:[#allocation2 + $0x1] ss:$4 sm:$0xff]  ;;  %v1420_v26 = vld [vmem:[#allocation2 + $0x2] ss:$4 sm:$0xff]  ;;  %2090 = vmatmul.msk.bf16.gmra.mxu0 %vm538_vm2, %v2162_v15  ;;  %2108 = vmatmul.msk.bf16.gmra.mxu1 %vm538_vm2, %v2180_v16 }
  0xae   :  { %v1492_v28 = vld [vmem:[#allocation2 + $0x3] ss:$4 sm:$0xff]  ;;  %v1563_v29 = vmax.f32 %v1276_v24, %v1348_v25  ;;  %v1294_v30 = vld [vmem:[#allocation2 + $0x120] ss:$4 sm:$0xff]  ;;  %v1366_v31 = vld [vmem:[#allocation2 + $0x121] ss:$4 sm:$0xff]  ;;  %2126 = vmatmul.msk.bf16.gmra.mxu2 %vm538_vm2, %v2198_v20  ;;  %2144 = vmatmul.msk.bf16.gmra.mxu3 %vm538_vm2, %v2216_v21 }
  0xaf   :  { %v1599_v32 = vmax.f32 %v1420_v26, %v1492_v28  ;;  %v1438_v33 = vld [vmem:[#allocation2 + $0x122] ss:$4 sm:$0xff]  ;;  %v1510_v34 = vld [vmem:[#allocation2 + $0x123] ss:$4 sm:$0xff]  ;;  %v1572_v35 = vmax.f32 %v1294_v30, %v1366_v31  ;;  %1243 = vst.msk [vmem:[#allocation2 + $0x378] sm:$0xff] %vm1131_vm3, %v1049_v22 }
  0xb0   :  { %v1608_v36 = vmax.f32 %v1438_v33, %v1510_v34  ;;  %1136 = vst.msk [vmem:[#allocation2 + $0x20] sm:$0xff] %vm1131_vm3, %v782_v23  ;;  %v2164_v28 = vld [vmem:[%s2997_s0 + $0x60] sm:$0xff]  ;;  %v2218_v34 = vld [vmem:[%s2997_s0 + $0x210] sm:$0xff] }
  0xb1   :  { %v1635_v37 = vmax.f32 %v1563_v29, %v1599_v32  ;;  %1172 = vst.msk [vmem:[#allocation2 + $0x140] sm:$0xff] %vm1131_vm3, %v872_v27  ;;  %v961_v38 = vpop.f32.mrf.mxu2  ;;  %v1051_v39 = vpop.f32.mrf.mxu3  ;;  %v2182_v29 = vld [vmem:[%s2997_s0 + $0xf0] sm:$0xff]  ;;  %v2200_v33 = vld [vmem:[%s2997_s0 + $0x180] sm:$0xff] }
  0xb2   :  { %v1644_v41 = vmax.f32 %v1572_v35, %v1608_v36  ;;  %v962_v42 = vadd.f32 %v2396_v40, %v961_v38  ;;  %v1052_v43 = vadd.f32 %v2396_v40, %v1051_v39  ;;  %v783_v44 = vpop.f32.mrf.mxu0  ;;  %v873_v45 = vpop.f32.mrf.mxu1 }
  0xb3   :  { %v1671_v46 = vmax.f32 %v1635_v37, 0.0  ;;  %v1312_v47 = vld [vmem:[#allocation2 + $0x240] ss:$4 sm:$0xff]  ;;  %v1384_v48 = vld [vmem:[#allocation2 + $0x241] ss:$4 sm:$0xff]  ;;  %v784_v55 = vadd.f32 %v2396_v40, %v783_v44  ;;  %v874_v60 = vadd.f32 %v2396_v40, %v873_v45 }
  0xb4   :  { %v1680_v49 = vmax.f32 %v1644_v41, 0.0  ;;  %v1456_v50 = vld [vmem:[#allocation2 + $0x242] ss:$4 sm:$0xff]  ;;  %v1528_v51 = vld [vmem:[#allocation2 + $0x243] ss:$4 sm:$0xff]  ;;  %v1581_v52 = vmax.f32 %v1312_v47, %v1384_v48  ;;  %1208 = vst.msk [vmem:[#allocation2 + $0x260] sm:$0xff] %vm1131_vm3, %v962_v42 }
  0xb5   :  { %v1707_v53 = vpack.c.bf16 %v1671_v46, %v1671_v46  ;;  %v1617_v54 = vmax.f32 %v1456_v50, %v1528_v51  ;;  %1244 = vst.msk [vmem:[#allocation2 + $0x380] sm:$0xff] %vm1131_vm3, %v1052_v43 }
  0xb6   :  { %v1716_v56 = vpack.c.bf16 %v1680_v49, %v1680_v49  ;;  %v1330_v57 = vld [vmem:[#allocation2 + $0x360] ss:$4 sm:$0xff]  ;;  %v1402_v58 = vld [vmem:[#allocation2 + $0x361] ss:$4 sm:$0xff]  ;;  %v1474_v59 = vld [vmem:[#allocation2 + $0x362] ss:$4 sm:$0xff] }
  0xb7   :  { %1744 = vst.msk [vmem:[%s2998_s3] sm:$0xf] %vm1743_vm4, %v1707_v53  ;;  %v1653_v61 = vmax.f32 %v1581_v52, %v1617_v54  ;;  %v1546_v62 = vld [vmem:[#allocation2 + $0x363] ss:$4 sm:$0xff]  ;;  %v1590_v63 = vmax.f32 %v1330_v57, %v1402_v58 }
  0xb8   :  { %1753 = vst.msk [vmem:[%s2998_s3 + $0x24] sm:$0xf] %vm1743_vm4, %v1716_v56  ;;  %v1626_v0 = vmax.f32 %v1474_v59, %v1546_v62 }
  0xb9   :  { %v1689_v1 = vmax.f32 %v1653_v61, 0.0  ;;  %1137 = vst.msk [vmem:[#allocation2 + $0x28] sm:$0xff] %vm1131_vm3, %v784_v55  ;;  %v963_v2 = vpop.f32.mrf.mxu2  ;;  %v1053_v3 = vpop.f32.mrf.mxu3 }
  0xba   :  { %v1662_v6 = vmax.f32 %v1590_v63, %v1626_v0  ;;  %1173 = vst.msk [vmem:[#allocation2 + $0x148] sm:$0xff] %vm1131_vm3, %v874_v60  ;;  %v964_v7 = vadd.f32 %v2396_v40, %v963_v2  ;;  %v1054_v8 = vadd.f32 %v2396_v40, %v1053_v3  ;;  %v786_v9 = vpop.f32.mrf.mxu0  ;;  %v876_v10 = vpop.f32.mrf.mxu1 }
  0xbb   :  { %v1725_v13 = vpack.c.bf16 %v1689_v1, %v1689_v1  ;;  %v787_v14 = vadd.f32 %v2396_v40, %v786_v9  ;;  %v877_v16 = vadd.f32 %v2396_v40, %v876_v10 }
  0xbc   :  { %v1698_v15 = vmax.f32 %v1662_v6, 0.0  ;;  %1209 = vst.msk [vmem:[#allocation2 + $0x268] sm:$0xff] %vm1131_vm3, %v964_v7 }
  0xbd   :  { %1762 = vst.msk [vmem:[%s2998_s3 + $0x48] sm:$0xf] %vm1743_vm4, %v1725_v13  ;;  %2091 = vmatmul.msk.bf16.gmra.mxu0 %vm538_vm2, %v2163_v4  ;;  %2109 = vmatmul.msk.bf16.gmra.mxu1 %vm538_vm2, %v2181_v5 }
  0xbe   :  { %v1734_v17 = vpack.c.bf16 %v1698_v15, %v1698_v15  ;;  %1245 = vst.msk [vmem:[#allocation2 + $0x388] sm:$0xff] %vm1131_vm3, %v1054_v8  ;;  %2127 = vmatmul.msk.bf16.gmra.mxu2 %vm538_vm2, %v2199_v11  ;;  %2145 = vmatmul.msk.bf16.gmra.mxu3 %vm538_vm2, %v2217_v12 }
  0xbf   :  { %1138 = vst.msk [vmem:[#allocation2 + $0x30] sm:$0xff] %vm1131_vm3, %v787_v14 }
  0xc0   :  { %1771 = vst.msk [vmem:[%s2998_s3 + $0x6c] sm:$0xf] %vm1743_vm4, %v1734_v17  ;;  %v2165_v17 = vld [vmem:[%s2997_s0 + $0x68] sm:$0xff] }
  0xc1   :  { %1174 = vst.msk [vmem:[#allocation2 + $0x150] sm:$0xff] %vm1131_vm3, %v877_v16  ;;  %v966_v18 = vpop.f32.mrf.mxu2  ;;  %v1056_v19 = vpop.f32.mrf.mxu3 }
  0xc2   :  { %v967_v20 = vadd.f32 %v2396_v40, %v966_v18  ;;  %v1057_v21 = vadd.f32 %v2396_v40, %v1056_v19  ;;  %v788_v22 = vpop.f32.mrf.mxu0  ;;  %v878_v23 = vpop.f32.mrf.mxu1  ;;  %v2183_v18 = vld [vmem:[%s2997_s0 + $0xf8] sm:$0xff] }
  0xc3   :  { %v789_v24 = vadd.f32 %v2396_v40, %v788_v22  ;;  %v879_v25 = vadd.f32 %v2396_v40, %v878_v23 }
  0xc4   :  { %1210 = vst.msk [vmem:[#allocation2 + $0x270] sm:$0xff] %vm1131_vm3, %v967_v20 }
  0xc5   :  { %1246 = vst.msk [vmem:[#allocation2 + $0x390] sm:$0xff] %vm1131_vm3, %v1057_v21 }
  0xc6   :  { %1139 = vst.msk [vmem:[#allocation2 + $0x38] sm:$0xff] %vm1131_vm3, %v789_v24  ;;  %v2201_v24 = vld [vmem:[%s2997_s0 + $0x188] sm:$0xff] }
  0xc7   :  { %1175 = vst.msk [vmem:[#allocation2 + $0x158] sm:$0xff] %vm1131_vm3, %v879_v25  ;;  %v2219_v25 = vld [vmem:[%s2997_s0 + $0x218] sm:$0xff] }
  0xc9   :  { %v968_v26 = vpop.f32.mrf.mxu2  ;;  %v1058_v27 = vpop.f32.mrf.mxu3 }
  0xca   :  { %v969_v30 = vadd.f32 %v2396_v40, %v968_v26  ;;  %v791_v31 = vpop.f32.mrf.mxu0  ;;  %v881_v32 = vpop.f32.mrf.mxu1  ;;  %v1059_v35 = vadd.f32 %v2396_v40, %v1058_v27 }
  0xcb   :  { %v792_v36 = vadd.f32 %v2396_v40, %v791_v31  ;;  %v882_v41 = vadd.f32 %v2396_v40, %v881_v32 }
  0xcc   :  { %1211 = vst.msk [vmem:[#allocation2 + $0x278] sm:$0xff] %vm1131_vm3, %v969_v30 }
  0xcd   :  { %v1278_v37 = vld [vmem:[#allocation2 + $0x20] ss:$4 sm:$0xff]  ;;  %v1350_v38 = vld [vmem:[#allocation2 + $0x21] ss:$4 sm:$0xff]  ;;  %v1422_v39 = vld [vmem:[#allocation2 + $0x22] ss:$4 sm:$0xff]  ;;  %2092 = vmatmul.msk.bf16.gmra.mxu0 %vm538_vm2, %v2164_v28  ;;  %2110 = vmatmul.msk.bf16.gmra.mxu1 %vm538_vm2, %v2182_v29 }
  0xce   :  { %v1494_v42 = vld [vmem:[#allocation2 + $0x23] ss:$4 sm:$0xff]  ;;  %v1564_v43 = vmax.f32 %v1278_v37, %v1350_v38  ;;  %v1296_v44 = vld [vmem:[#allocation2 + $0x140] ss:$4 sm:$0xff]  ;;  %v1368_v45 = vld [vmem:[#allocation2 + $0x141] ss:$4 sm:$0xff]  ;;  %2128 = vmatmul.msk.bf16.gmra.mxu2 %vm538_vm2, %v2200_v33  ;;  %2146 = vmatmul.msk.bf16.gmra.mxu3 %vm538_vm2, %v2218_v34 }
  0xcf   :  { %v1600_v46 = vmax.f32 %v1422_v39, %v1494_v42  ;;  %v1440_v47 = vld [vmem:[#allocation2 + $0x142] ss:$4 sm:$0xff]  ;;  %v1512_v48 = vld [vmem:[#allocation2 + $0x143] ss:$4 sm:$0xff]  ;;  %v1573_v49 = vmax.f32 %v1296_v44, %v1368_v45  ;;  %1247 = vst.msk [vmem:[#allocation2 + $0x398] sm:$0xff] %vm1131_vm3, %v1059_v35 }
  0xd0   :  { %v1609_v50 = vmax.f32 %v1440_v47, %v1512_v48  ;;  %1140 = vst.msk [vmem:[#allocation2 + $0x40] sm:$0xff] %vm1131_vm3, %v792_v36  ;;  %v2166_v42 = vld [vmem:[%s2997_s0 + $0x70] sm:$0xff]  ;;  %v2220_v48 = vld [vmem:[%s2997_s0 + $0x220] sm:$0xff] }
  0xd1   :  { %v1636_v51 = vmax.f32 %v1564_v43, %v1600_v46  ;;  %1176 = vst.msk [vmem:[#allocation2 + $0x160] sm:$0xff] %vm1131_vm3, %v882_v41  ;;  %v971_v52 = vpop.f32.mrf.mxu2  ;;  %v1061_v53 = vpop.f32.mrf.mxu3  ;;  %v2184_v43 = vld [vmem:[%s2997_s0 + $0x100] sm:$0xff]  ;;  %v2202_v47 = vld [vmem:[%s2997_s0 + $0x190] sm:$0xff] }
  0xd2   :  { %v1645_v54 = vmax.f32 %v1573_v49, %v1609_v50  ;;  %v972_v55 = vadd.f32 %v2396_v40, %v971_v52  ;;  %v1062_v56 = vadd.f32 %v2396_v40, %v1061_v53  ;;  %v793_v57 = vpop.f32.mrf.mxu0  ;;  %v883_v58 = vpop.f32.mrf.mxu1 }
  0xd3   :  { %v1672_v59 = vmax.f32 %v1636_v51, 0.0  ;;  %v1314_v60 = vld [vmem:[#allocation2 + $0x260] ss:$4 sm:$0xff]  ;;  %v1386_v61 = vld [vmem:[#allocation2 + $0x261] ss:$4 sm:$0xff]  ;;  %v794_v4 = vadd.f32 %v2396_v40, %v793_v57  ;;  %v884_v9 = vadd.f32 %v2396_v40, %v883_v58 }
  0xd4   :  { %v1681_v62 = vmax.f32 %v1645_v54, 0.0  ;;  %v1458_v63 = vld [vmem:[#allocation2 + $0x262] ss:$4 sm:$0xff]  ;;  %v1530_v0 = vld [vmem:[#allocation2 + $0x263] ss:$4 sm:$0xff]  ;;  %v1582_v1 = vmax.f32 %v1314_v60, %v1386_v61  ;;  %1212 = vst.msk [vmem:[#allocation2 + $0x280] sm:$0xff] %vm1131_vm3, %v972_v55 }
  0xd5   :  { %v1708_v2 = vpack.c.bf16 %v1672_v59, %v1672_v59  ;;  %v1618_v3 = vmax.f32 %v1458_v63, %v1530_v0  ;;  %1248 = vst.msk [vmem:[#allocation2 + $0x3a0] sm:$0xff] %vm1131_vm3, %v1062_v56 }
  0xd6   :  { %v1717_v5 = vpack.c.bf16 %v1681_v62, %v1681_v62  ;;  %v1332_v6 = vld [vmem:[#allocation2 + $0x380] ss:$4 sm:$0xff]  ;;  %v1404_v7 = vld [vmem:[#allocation2 + $0x381] ss:$4 sm:$0xff]  ;;  %v1476_v8 = vld [vmem:[#allocation2 + $0x382] ss:$4 sm:$0xff] }
  0xd7   :  { %1745 = vst.msk [vmem:[%s2998_s3 + $0x4] sm:$0xf] %vm1743_vm4, %v1708_v2  ;;  %v1654_v10 = vmax.f32 %v1582_v1, %v1618_v3  ;;  %v1548_v11 = vld [vmem:[#allocation2 + $0x383] ss:$4 sm:$0xff]  ;;  %v1591_v12 = vmax.f32 %v1332_v6, %v1404_v7 }
  0xd8   :  { %1754 = vst.msk [vmem:[%s2998_s3 + $0x28] sm:$0xf] %vm1743_vm4, %v1717_v5  ;;  %v1627_v13 = vmax.f32 %v1476_v8, %v1548_v11 }
  0xd9   :  { %v1690_v14 = vmax.f32 %v1654_v10, 0.0  ;;  %1141 = vst.msk [vmem:[#allocation2 + $0x48] sm:$0xff] %vm1131_vm3, %v794_v4  ;;  %v973_v15 = vpop.f32.mrf.mxu2  ;;  %v1063_v16 = vpop.f32.mrf.mxu3 }
  0xda   :  { %v1663_v19 = vmax.f32 %v1591_v12, %v1627_v13  ;;  %1177 = vst.msk [vmem:[#allocation2 + $0x168] sm:$0xff] %vm1131_vm3, %v884_v9  ;;  %v974_v20 = vadd.f32 %v2396_v40, %v973_v15  ;;  %v1064_v21 = vadd.f32 %v2396_v40, %v1063_v16  ;;  %v796_v22 = vpop.f32.mrf.mxu0  ;;  %v886_v23 = vpop.f32.mrf.mxu1 }
  0xdb   :  { %v1726_v26 = vpack.c.bf16 %v1690_v14, %v1690_v14  ;;  %v797_v27 = vadd.f32 %v2396_v40, %v796_v22  ;;  %v887_v29 = vadd.f32 %v2396_v40, %v886_v23 }
  0xdc   :  { %v1699_v28 = vmax.f32 %v1663_v19, 0.0  ;;  %1213 = vst.msk [vmem:[#allocation2 + $0x288] sm:$0xff] %vm1131_vm3, %v974_v20 }
  0xdd   :  { %1763 = vst.msk [vmem:[%s2998_s3 + $0x4c] sm:$0xf] %vm1743_vm4, %v1726_v26  ;;  %2093 = vmatmul.msk.bf16.gmra.mxu0 %vm538_vm2, %v2165_v17  ;;  %2111 = vmatmul.msk.bf16.gmra.mxu1 %vm538_vm2, %v2183_v18 }
  0xde   :  { %v1735_v30 = vpack.c.bf16 %v1699_v28, %v1699_v28  ;;  %1249 = vst.msk [vmem:[#allocation2 + $0x3a8] sm:$0xff] %vm1131_vm3, %v1064_v21  ;;  %2129 = vmatmul.msk.bf16.gmra.mxu2 %vm538_vm2, %v2201_v24  ;;  %2147 = vmatmul.msk.bf16.gmra.mxu3 %vm538_vm2, %v2219_v25 }
  0xdf   :  { %1142 = vst.msk [vmem:[#allocation2 + $0x50] sm:$0xff] %vm1131_vm3, %v797_v27 }
  0xe0   :  { %1772 = vst.msk [vmem:[%s2998_s3 + $0x70] sm:$0xf] %vm1743_vm4, %v1735_v30  ;;  %v2167_v30 = vld [vmem:[%s2997_s0 + $0x78] sm:$0xff] }
  0xe1   :  { %1178 = vst.msk [vmem:[#allocation2 + $0x170] sm:$0xff] %vm1131_vm3, %v887_v29  ;;  %v976_v31 = vpop.f32.mrf.mxu2  ;;  %v1066_v32 = vpop.f32.mrf.mxu3 }
  0xe2   :  { %v977_v33 = vadd.f32 %v2396_v40, %v976_v31  ;;  %v1067_v34 = vadd.f32 %v2396_v40, %v1066_v32  ;;  %v798_v35 = vpop.f32.mrf.mxu0  ;;  %v888_v36 = vpop.f32.mrf.mxu1  ;;  %v2185_v31 = vld [vmem:[%s2997_s0 + $0x108] sm:$0xff] }
  0xe3   :  { %v799_v37 = vadd.f32 %v2396_v40, %v798_v35  ;;  %v889_v38 = vadd.f32 %v2396_v40, %v888_v36 }
  0xe4   :  { %1214 = vst.msk [vmem:[#allocation2 + $0x290] sm:$0xff] %vm1131_vm3, %v977_v33 }
  0xe5   :  { %1250 = vst.msk [vmem:[#allocation2 + $0x3b0] sm:$0xff] %vm1131_vm3, %v1067_v34 }
  0xe6   :  { %1143 = vst.msk [vmem:[#allocation2 + $0x58] sm:$0xff] %vm1131_vm3, %v799_v37  ;;  %v2203_v37 = vld [vmem:[%s2997_s0 + $0x198] sm:$0xff] }
  0xe7   :  { %1179 = vst.msk [vmem:[#allocation2 + $0x178] sm:$0xff] %vm1131_vm3, %v889_v38  ;;  %v2221_v38 = vld [vmem:[%s2997_s0 + $0x228] sm:$0xff] }
  0xe9   :  { %v978_v39 = vpop.f32.mrf.mxu2  ;;  %v1068_v41 = vpop.f32.mrf.mxu3 }
  0xea   :  { %v979_v44 = vadd.f32 %v2396_v40, %v978_v39  ;;  %v801_v45 = vpop.f32.mrf.mxu0  ;;  %v891_v46 = vpop.f32.mrf.mxu1  ;;  %v1069_v49 = vadd.f32 %v2396_v40, %v1068_v41 }
  0xeb   :  { %v802_v50 = vadd.f32 %v2396_v40, %v801_v45  ;;  %v892_v54 = vadd.f32 %v2396_v40, %v891_v46 }
  0xec   :  { %1215 = vst.msk [vmem:[#allocation2 + $0x298] sm:$0xff] %vm1131_vm3, %v979_v44 }
  0xed   :  { %v1280_v51 = vld [vmem:[#allocation2 + $0x40] ss:$4 sm:$0xff]  ;;  %v1352_v52 = vld [vmem:[#allocation2 + $0x41] ss:$4 sm:$0xff]  ;;  %v1424_v53 = vld [vmem:[#allocation2 + $0x42] ss:$4 sm:$0xff]  ;;  %2094 = vmatmul.msk.bf16.gmra.mxu0 %vm538_vm2, %v2166_v42  ;;  %2112 = vmatmul.msk.bf16.gmra.mxu1 %vm538_vm2, %v2184_v43 }
  0xee   :  { %v1496_v55 = vld [vmem:[#allocation2 + $0x43] ss:$4 sm:$0xff]  ;;  %v1565_v56 = vmax.f32 %v1280_v51, %v1352_v52  ;;  %v1298_v57 = vld [vmem:[#allocation2 + $0x160] ss:$4 sm:$0xff]  ;;  %v1370_v58 = vld [vmem:[#allocation2 + $0x161] ss:$4 sm:$0xff]  ;;  %2130 = vmatmul.msk.bf16.gmra.mxu2 %vm538_vm2, %v2202_v47  ;;  %2148 = vmatmul.msk.bf16.gmra.mxu3 %vm538_vm2, %v2220_v48 }
  0xef   :  { %v1601_v59 = vmax.f32 %v1424_v53, %v1496_v55  ;;  %v1442_v60 = vld [vmem:[#allocation2 + $0x162] ss:$4 sm:$0xff]  ;;  %v1514_v61 = vld [vmem:[#allocation2 + $0x163] ss:$4 sm:$0xff]  ;;  %v1574_v62 = vmax.f32 %v1298_v57, %v1370_v58  ;;  %1251 = vst.msk [vmem:[#allocation2 + $0x3b8] sm:$0xff] %vm1131_vm3, %v1069_v49 }
  0xf0   :  { %v1610_v63 = vmax.f32 %v1442_v60, %v1514_v61  ;;  %1144 = vst.msk [vmem:[#allocation2 + $0x60] sm:$0xff] %vm1131_vm3, %v802_v50  ;;  %v2168_v55 = vld [vmem:[%s2997_s0 + $0x80] sm:$0xff]  ;;  %v2222_v61 = vld [vmem:[%s2997_s0 + $0x230] sm:$0xff] }
  0xf1   :  { %v1637_v0 = vmax.f32 %v1565_v56, %v1601_v59  ;;  %1180 = vst.msk [vmem:[#allocation2 + $0x180] sm:$0xff] %vm1131_vm3, %v892_v54  ;;  %v981_v1 = vpop.f32.mrf.mxu2  ;;  %v1071_v2 = vpop.f32.mrf.mxu3  ;;  %v2186_v56 = vld [vmem:[%s2997_s0 + $0x110] sm:$0xff]  ;;  %v2204_v60 = vld [vmem:[%s2997_s0 + $0x1a0] sm:$0xff] }
  0xf2   :  { %v1646_v3 = vmax.f32 %v1574_v62, %v1610_v63  ;;  %v982_v4 = vadd.f32 %v2396_v40, %v981_v1  ;;  %v1072_v5 = vadd.f32 %v2396_v40, %v1071_v2  ;;  %v803_v6 = vpop.f32.mrf.mxu0  ;;  %v893_v7 = vpop.f32.mrf.mxu1 }
  0xf3   :  { %v1673_v8 = vmax.f32 %v1637_v0, 0.0  ;;  %v1316_v9 = vld [vmem:[#allocation2 + $0x280] ss:$4 sm:$0xff]  ;;  %v1388_v10 = vld [vmem:[#allocation2 + $0x281] ss:$4 sm:$0xff]  ;;  %v804_v17 = vadd.f32 %v2396_v40, %v803_v6  ;;  %v894_v22 = vadd.f32 %v2396_v40, %v893_v7 }
  0xf4   :  { %v1682_v11 = vmax.f32 %v1646_v3, 0.0  ;;  %v1460_v12 = vld [vmem:[#allocation2 + $0x282] ss:$4 sm:$0xff]  ;;  %v1532_v13 = vld [vmem:[#allocation2 + $0x283] ss:$4 sm:$0xff]  ;;  %v1583_v14 = vmax.f32 %v1316_v9, %v1388_v10  ;;  %1216 = vst.msk [vmem:[#allocation2 + $0x2a0] sm:$0xff] %vm1131_vm3, %v982_v4 }
  0xf5   :  { %v1709_v15 = vpack.c.bf16 %v1673_v8, %v1673_v8  ;;  %v1619_v16 = vmax.f32 %v1460_v12, %v1532_v13  ;;  %1252 = vst.msk [vmem:[#allocation2 + $0x3c0] sm:$0xff] %vm1131_vm3, %v1072_v5 }
  0xf6   :  { %v1718_v18 = vpack.c.bf16 %v1682_v11, %v1682_v11  ;;  %v1334_v19 = vld [vmem:[#allocation2 + $0x3a0] ss:$4 sm:$0xff]  ;;  %v1406_v20 = vld [vmem:[#allocation2 + $0x3a1] ss:$4 sm:$0xff]  ;;  %v1478_v21 = vld [vmem:[#allocation2 + $0x3a2] ss:$4 sm:$0xff] }
  0xf7   :  { %1746 = vst.msk [vmem:[%s2998_s3 + $0x8] sm:$0xf] %vm1743_vm4, %v1709_v15  ;;  %v1655_v23 = vmax.f32 %v1583_v14, %v1619_v16  ;;  %v1550_v24 = vld [vmem:[#allocation2 + $0x3a3] ss:$4 sm:$0xff]  ;;  %v1592_v25 = vmax.f32 %v1334_v19, %v1406_v20 }
  0xf8   :  { %1755 = vst.msk [vmem:[%s2998_s3 + $0x2c] sm:$0xf] %vm1743_vm4, %v1718_v18  ;;  %v1628_v26 = vmax.f32 %v1478_v21, %v1550_v24 }
  0xf9   :  { %v1691_v27 = vmax.f32 %v1655_v23, 0.0  ;;  %1145 = vst.msk [vmem:[#allocation2 + $0x68] sm:$0xff] %vm1131_vm3, %v804_v17  ;;  %v983_v28 = vpop.f32.mrf.mxu2  ;;  %v1073_v29 = vpop.f32.mrf.mxu3 }
  0xfa   :  { %v1664_v32 = vmax.f32 %v1592_v25, %v1628_v26  ;;  %1181 = vst.msk [vmem:[#allocation2 + $0x188] sm:$0xff] %vm1131_vm3, %v894_v22  ;;  %v984_v33 = vadd.f32 %v2396_v40, %v983_v28  ;;  %v1074_v34 = vadd.f32 %v2396_v40, %v1073_v29  ;;  %v806_v35 = vpop.f32.mrf.mxu0  ;;  %v896_v36 = vpop.f32.mrf.mxu1 }
  0xfb   :  { %v1727_v39 = vpack.c.bf16 %v1691_v27, %v1691_v27  ;;  %v807_v41 = vadd.f32 %v2396_v40, %v806_v35  ;;  %v897_v43 = vadd.f32 %v2396_v40, %v896_v36 }
  0xfc   :  { %v1700_v42 = vmax.f32 %v1664_v32, 0.0  ;;  %1217 = vst.msk [vmem:[#allocation2 + $0x2a8] sm:$0xff] %vm1131_vm3, %v984_v33 }
  0xfd   :  { %1764 = vst.msk [vmem:[%s2998_s3 + $0x50] sm:$0xf] %vm1743_vm4, %v1727_v39  ;;  %2095 = vmatmul.msk.bf16.gmra.mxu0 %vm538_vm2, %v2167_v30  ;;  %2113 = vmatmul.msk.bf16.gmra.mxu1 %vm538_vm2, %v2185_v31 }
  0xfe   :  { %v1736_v44 = vpack.c.bf16 %v1700_v42, %v1700_v42  ;;  %1253 = vst.msk [vmem:[#allocation2 + $0x3c8] sm:$0xff] %vm1131_vm3, %v1074_v34  ;;  %2131 = vmatmul.msk.bf16.gmra.mxu2 %vm538_vm2, %v2203_v37  ;;  %2149 = vmatmul.msk.bf16.gmra.mxu3 %vm538_vm2, %v2221_v38 }
  0xff   :  { %1146 = vst.msk [vmem:[#allocation2 + $0x70] sm:$0xff] %vm1131_vm3, %v807_v41 }
 0x100   :  { %1773 = vst.msk [vmem:[%s2998_s3 + $0x74] sm:$0xf] %vm1743_vm4, %v1736_v44  ;;  %v2169_v44 = vld [vmem:[%s2997_s0 + $0x88] sm:$0xff] }
 0x101   :  { %1182 = vst.msk [vmem:[#allocation2 + $0x190] sm:$0xff] %vm1131_vm3, %v897_v43  ;;  %v986_v45 = vpop.f32.mrf.mxu2  ;;  %v1076_v46 = vpop.f32.mrf.mxu3 }
 0x102   :  { %v987_v47 = vadd.f32 %v2396_v40, %v986_v45  ;;  %v1077_v48 = vadd.f32 %v2396_v40, %v1076_v46  ;;  %v808_v49 = vpop.f32.mrf.mxu0  ;;  %v898_v50 = vpop.f32.mrf.mxu1  ;;  %v2187_v45 = vld [vmem:[%s2997_s0 + $0x118] sm:$0xff] }
 0x103   :  { %v809_v51 = vadd.f32 %v2396_v40, %v808_v49  ;;  %v899_v52 = vadd.f32 %v2396_v40, %v898_v50 }
 0x104   :  { %1218 = vst.msk [vmem:[#allocation2 + $0x2b0] sm:$0xff] %vm1131_vm3, %v987_v47 }
 0x105   :  { %1254 = vst.msk [vmem:[#allocation2 + $0x3d0] sm:$0xff] %vm1131_vm3, %v1077_v48 }
 0x106   :  { %1147 = vst.msk [vmem:[#allocation2 + $0x78] sm:$0xff] %vm1131_vm3, %v809_v51  ;;  %v2205_v51 = vld [vmem:[%s2997_s0 + $0x1a8] sm:$0xff] }
 0x107   :  { %1183 = vst.msk [vmem:[#allocation2 + $0x198] sm:$0xff] %vm1131_vm3, %v899_v52  ;;  %v2223_v52 = vld [vmem:[%s2997_s0 + $0x238] sm:$0xff] }
 0x109   :  { %v988_v53 = vpop.f32.mrf.mxu2  ;;  %v1078_v54 = vpop.f32.mrf.mxu3 }
 0x10a   :  { %v989_v57 = vadd.f32 %v2396_v40, %v988_v53  ;;  %v811_v58 = vpop.f32.mrf.mxu0  ;;  %v901_v59 = vpop.f32.mrf.mxu1  ;;  %v1079_v62 = vadd.f32 %v2396_v40, %v1078_v54 }
 0x10b   :  { %v812_v63 = vadd.f32 %v2396_v40, %v811_v58  ;;  %v902_v3 = vadd.f32 %v2396_v40, %v901_v59 }
 0x10c   :  { %1219 = vst.msk [vmem:[#allocation2 + $0x2b8] sm:$0xff] %vm1131_vm3, %v989_v57 }
 0x10d   :  { %v1282_v0 = vld [vmem:[#allocation2 + $0x60] ss:$4 sm:$0xff]  ;;  %v1354_v1 = vld [vmem:[#allocation2 + $0x61] ss:$4 sm:$0xff]  ;;  %v1426_v2 = vld [vmem:[#allocation2 + $0x62] ss:$4 sm:$0xff]  ;;  %2096 = vmatmul.msk.bf16.gmra.mxu0 %vm538_vm2, %v2168_v55  ;;  %2114 = vmatmul.msk.bf16.gmra.mxu1 %vm538_vm2, %v2186_v56 }
 0x10e   :  { %v1498_v4 = vld [vmem:[#allocation2 + $0x63] ss:$4 sm:$0xff]  ;;  %v1566_v5 = vmax.f32 %v1282_v0, %v1354_v1  ;;  %v1300_v6 = vld [vmem:[#allocation2 + $0x180] ss:$4 sm:$0xff]  ;;  %v1372_v7 = vld [vmem:[#allocation2 + $0x181] ss:$4 sm:$0xff]  ;;  %2132 = vmatmul.msk.bf16.gmra.mxu2 %vm538_vm2, %v2204_v60  ;;  %2150 = vmatmul.msk.bf16.gmra.mxu3 %vm538_vm2, %v2222_v61 }
 0x10f   :  { %v1602_v8 = vmax.f32 %v1426_v2, %v1498_v4  ;;  %v1444_v9 = vld [vmem:[#allocation2 + $0x182] ss:$4 sm:$0xff]  ;;  %v1516_v10 = vld [vmem:[#allocation2 + $0x183] ss:$4 sm:$0xff]  ;;  %v1575_v11 = vmax.f32 %v1300_v6, %v1372_v7  ;;  %1255 = vst.msk [vmem:[#allocation2 + $0x3d8] sm:$0xff] %vm1131_vm3, %v1079_v62 }
 0x110   :  { %v1611_v12 = vmax.f32 %v1444_v9, %v1516_v10  ;;  %1148 = vst.msk [vmem:[#allocation2 + $0x80] sm:$0xff] %vm1131_vm3, %v812_v63 }
 0x111   :  { %v1638_v13 = vmax.f32 %v1566_v5, %v1602_v8  ;;  %1184 = vst.msk [vmem:[#allocation2 + $0x1a0] sm:$0xff] %vm1131_vm3, %v902_v3  ;;  %v991_v14 = vpop.f32.mrf.mxu2  ;;  %v1081_v15 = vpop.f32.mrf.mxu3 }
 0x112   :  { %v1647_v16 = vmax.f32 %v1575_v11, %v1611_v12  ;;  %v992_v17 = vadd.f32 %v2396_v40, %v991_v14  ;;  %v1082_v18 = vadd.f32 %v2396_v40, %v1081_v15  ;;  %v813_v19 = vpop.f32.mrf.mxu0  ;;  %v903_v20 = vpop.f32.mrf.mxu1 }
 0x113   :  { %v1674_v21 = vmax.f32 %v1638_v13, 0.0  ;;  %v1318_v22 = vld [vmem:[#allocation2 + $0x2a0] ss:$4 sm:$0xff]  ;;  %v1390_v23 = vld [vmem:[#allocation2 + $0x2a1] ss:$4 sm:$0xff]  ;;  %v814_v30 = vadd.f32 %v2396_v40, %v813_v19  ;;  %v904_v35 = vadd.f32 %v2396_v40, %v903_v20 }
 0x114   :  { %v1683_v24 = vmax.f32 %v1647_v16, 0.0  ;;  %v1462_v25 = vld [vmem:[#allocation2 + $0x2a2] ss:$4 sm:$0xff]  ;;  %v1534_v26 = vld [vmem:[#allocation2 + $0x2a3] ss:$4 sm:$0xff]  ;;  %v1584_v27 = vmax.f32 %v1318_v22, %v1390_v23  ;;  %1220 = vst.msk [vmem:[#allocation2 + $0x2c0] sm:$0xff] %vm1131_vm3, %v992_v17 }
 0x115   :  { %v1710_v28 = vpack.c.bf16 %v1674_v21, %v1674_v21  ;;  %v1620_v29 = vmax.f32 %v1462_v25, %v1534_v26  ;;  %1256 = vst.msk [vmem:[#allocation2 + $0x3e0] sm:$0xff] %vm1131_vm3, %v1082_v18 }
 0x116   :  { %v1719_v31 = vpack.c.bf16 %v1683_v24, %v1683_v24  ;;  %v1336_v32 = vld [vmem:[#allocation2 + $0x3c0] ss:$4 sm:$0xff]  ;;  %v1408_v33 = vld [vmem:[#allocation2 + $0x3c1] ss:$4 sm:$0xff]  ;;  %v1480_v34 = vld [vmem:[#allocation2 + $0x3c2] ss:$4 sm:$0xff] }
 0x117   :  { %1747 = vst.msk [vmem:[%s2998_s3 + $0xc] sm:$0xf] %vm1743_vm4, %v1710_v28  ;;  %v1656_v36 = vmax.f32 %v1584_v27, %v1620_v29  ;;  %v1552_v37 = vld [vmem:[#allocation2 + $0x3c3] ss:$4 sm:$0xff]  ;;  %v1593_v38 = vmax.f32 %v1336_v32, %v1408_v33 }
 0x118   :  { %1756 = vst.msk [vmem:[%s2998_s3 + $0x30] sm:$0xf] %vm1743_vm4, %v1719_v31  ;;  %v1629_v39 = vmax.f32 %v1480_v34, %v1552_v37 }
 0x119   :  { %v1692_v41 = vmax.f32 %v1656_v36, 0.0  ;;  %1149 = vst.msk [vmem:[#allocation2 + $0x88] sm:$0xff] %vm1131_vm3, %v814_v30  ;;  %v993_v42 = vpop.f32.mrf.mxu2  ;;  %v1083_v43 = vpop.f32.mrf.mxu3 }
 0x11a   :  { %v1665_v46 = vmax.f32 %v1593_v38, %v1629_v39  ;;  %1185 = vst.msk [vmem:[#allocation2 + $0x1a8] sm:$0xff] %vm1131_vm3, %v904_v35  ;;  %v994_v47 = vadd.f32 %v2396_v40, %v993_v42  ;;  %v1084_v48 = vadd.f32 %v2396_v40, %v1083_v43  ;;  %v816_v49 = vpop.f32.mrf.mxu0  ;;  %v906_v50 = vpop.f32.mrf.mxu1  ;;  %v2793_v39 = vld [vmem:[%s2996_s2] ss:$0 sm:$0xff] }
 0x11b   :  { %v1728_v53 = vpack.c.bf16 %v1692_v41, %v1692_v41  ;;  %v817_v54 = vadd.f32 %v2396_v40, %v816_v49  ;;  %v907_v56 = vadd.f32 %v2396_v40, %v906_v50 }
 0x11c   :  { %v1701_v55 = vmax.f32 %v1665_v46, 0.0  ;;  %1221 = vst.msk [vmem:[#allocation2 + $0x2c8] sm:$0xff] %vm1131_vm3, %v994_v47 }
 0x11d   :  { %1765 = vst.msk [vmem:[%s2998_s3 + $0x54] sm:$0xf] %vm1743_vm4, %v1728_v53  ;;  %2097 = vmatmul.msk.bf16.gmra.mxu0 %vm538_vm2, %v2169_v44  ;;  %2115 = vmatmul.msk.bf16.gmra.mxu1 %vm538_vm2, %v2187_v45 }
 0x11e   :  { %v1737_v57 = vpack.c.bf16 %v1701_v55, %v1701_v55  ;;  %1257 = vst.msk [vmem:[#allocation2 + $0x3e8] sm:$0xff] %vm1131_vm3, %v1084_v48  ;;  %2133 = vmatmul.msk.bf16.gmra.mxu2 %vm538_vm2, %v2205_v51  ;;  %2151 = vmatmul.msk.bf16.gmra.mxu3 %vm538_vm2, %v2223_v52 }
 0x11f   :  { %1150 = vst.msk [vmem:[#allocation2 + $0x90] sm:$0xff] %vm1131_vm3, %v817_v54 }
 0x120   :  { %1774 = vst.msk [vmem:[%s2998_s3 + $0x78] sm:$0xf] %vm1743_vm4, %v1737_v57 }
 0x121   :  { %1186 = vst.msk [vmem:[#allocation2 + $0x1b0] sm:$0xff] %vm1131_vm3, %v907_v56  ;;  %v996_v58 = vpop.f32.mrf.mxu2  ;;  %v1086_v59 = vpop.f32.mrf.mxu3 }
 0x122   :  { %v997_v60 = vadd.f32 %v2396_v40, %v996_v58  ;;  %v1087_v61 = vadd.f32 %v2396_v40, %v1086_v59  ;;  %v818_v62 = vpop.f32.mrf.mxu0  ;;  %v908_v63 = vpop.f32.mrf.mxu1 }
 0x123   :  { %v819_v0 = vadd.f32 %v2396_v40, %v818_v62  ;;  %v909_v1 = vadd.f32 %v2396_v40, %v908_v63 }
 0x124   :  { %1222 = vst.msk [vmem:[#allocation2 + $0x2d0] sm:$0xff] %vm1131_vm3, %v997_v60 }
 0x125   :  { %1258 = vst.msk [vmem:[#allocation2 + $0x3f0] sm:$0xff] %vm1131_vm3, %v1087_v61 }
 0x126   :  { %1151 = vst.msk [vmem:[#allocation2 + $0x98] sm:$0xff] %vm1131_vm3, %v819_v0 }
 0x127   :  { %1187 = vst.msk [vmem:[#allocation2 + $0x1b8] sm:$0xff] %vm1131_vm3, %v909_v1 }
 0x129   :  { %v998_v2 = vpop.f32.mrf.mxu2  ;;  %v1088_v3 = vpop.f32.mrf.mxu3 }
 0x12a   :  { %v999_v4 = vadd.f32 %v2396_v40, %v998_v2  ;;  %v821_v5 = vpop.f32.mrf.mxu0  ;;  %v911_v6 = vpop.f32.mrf.mxu1  ;;  %v1089_v7 = vadd.f32 %v2396_v40, %v1088_v3 }
 0x12b   :  { %v822_v8 = vadd.f32 %v2396_v40, %v821_v5  ;;  %v912_v12 = vadd.f32 %v2396_v40, %v911_v6 }
 0x12c   :  { %1223 = vst.msk [vmem:[#allocation2 + $0x2d8] sm:$0xff] %vm1131_vm3, %v999_v4 }
 0x12d   :  { %v1284_v9 = vld [vmem:[#allocation2 + $0x80] ss:$4 sm:$0xff]  ;;  %v1356_v10 = vld [vmem:[#allocation2 + $0x81] ss:$4 sm:$0xff]  ;;  %v1428_v11 = vld [vmem:[#allocation2 + $0x82] ss:$4 sm:$0xff] }
 0x12e   :  { %v1500_v13 = vld [vmem:[#allocation2 + $0x83] ss:$4 sm:$0xff]  ;;  %v1567_v14 = vmax.f32 %v1284_v9, %v1356_v10  ;;  %v1302_v15 = vld [vmem:[#allocation2 + $0x1a0] ss:$4 sm:$0xff]  ;;  %v1374_v16 = vld [vmem:[#allocation2 + $0x1a1] ss:$4 sm:$0xff] }
 0x12f   :  { %v1603_v17 = vmax.f32 %v1428_v11, %v1500_v13  ;;  %v1446_v18 = vld [vmem:[#allocation2 + $0x1a2] ss:$4 sm:$0xff]  ;;  %v1518_v19 = vld [vmem:[#allocation2 + $0x1a3] ss:$4 sm:$0xff]  ;;  %v1576_v20 = vmax.f32 %v1302_v15, %v1374_v16  ;;  %1259 = vst.msk [vmem:[#allocation2 + $0x3f8] sm:$0xff] %vm1131_vm3, %v1089_v7 }
 0x130   :  { %v1612_v21 = vmax.f32 %v1446_v18, %v1518_v19  ;;  %1152 = vst.msk [vmem:[#allocation2 + $0xa0] sm:$0xff] %vm1131_vm3, %v822_v8 }
 0x131   :  { %v1639_v22 = vmax.f32 %v1567_v14, %v1603_v17  ;;  %1188 = vst.msk [vmem:[#allocation2 + $0x1c0] sm:$0xff] %vm1131_vm3, %v912_v12  ;;  %v1001_v23 = vpop.f32.mrf.mxu2  ;;  %v1091_v24 = vpop.f32.mrf.mxu3 }
 0x132   :  { %v1648_v25 = vmax.f32 %v1576_v20, %v1612_v21  ;;  %v1002_v26 = vadd.f32 %v2396_v40, %v1001_v23  ;;  %v1092_v27 = vadd.f32 %v2396_v40, %v1091_v24  ;;  %v823_v28 = vpop.f32.mrf.mxu0  ;;  %v913_v29 = vpop.f32.mrf.mxu1 }
 0x133   :  { %v1675_v30 = vmax.f32 %v1639_v22, 0.0  ;;  %v1320_v31 = vld [vmem:[#allocation2 + $0x2c0] ss:$4 sm:$0xff]  ;;  %v1392_v32 = vld [vmem:[#allocation2 + $0x2c1] ss:$4 sm:$0xff]  ;;  %v824_v40 = vadd.f32 %v2793_v39, %v823_v28  ;;  %v914_v45 = vadd.f32 %v2793_v39, %v913_v29 }
 0x134   :  { %v1684_v33 = vmax.f32 %v1648_v25, 0.0  ;;  %v1464_v34 = vld [vmem:[#allocation2 + $0x2c2] ss:$4 sm:$0xff]  ;;  %v1536_v35 = vld [vmem:[#allocation2 + $0x2c3] ss:$4 sm:$0xff]  ;;  %v1585_v36 = vmax.f32 %v1320_v31, %v1392_v32  ;;  %1224 = vst.msk [vmem:[#allocation2 + $0x2e0] sm:$0xff] %vm1131_vm3, %v1002_v26 }
 0x135   :  { %v1711_v37 = vpack.c.bf16 %v1675_v30, %v1675_v30  ;;  %v1621_v38 = vmax.f32 %v1464_v34, %v1536_v35  ;;  %1260 = vst.msk [vmem:[#allocation2 + $0x400] sm:$0xff] %vm1131_vm3, %v1092_v27 }
 0x136   :  { %v1720_v41 = vpack.c.bf16 %v1684_v33, %v1684_v33  ;;  %v1338_v42 = vld [vmem:[#allocation2 + $0x3e0] ss:$4 sm:$0xff]  ;;  %v1410_v43 = vld [vmem:[#allocation2 + $0x3e1] ss:$4 sm:$0xff]  ;;  %v1482_v44 = vld [vmem:[#allocation2 + $0x3e2] ss:$4 sm:$0xff] }
 0x137   :  { %1748 = vst.msk [vmem:[%s2998_s3 + $0x10] sm:$0xf] %vm1743_vm4, %v1711_v37  ;;  %v1657_v46 = vmax.f32 %v1585_v36, %v1621_v38  ;;  %v1554_v47 = vld [vmem:[#allocation2 + $0x3e3] ss:$4 sm:$0xff]  ;;  %v1594_v48 = vmax.f32 %v1338_v42, %v1410_v43 }
 0x138   :  { %1757 = vst.msk [vmem:[%s2998_s3 + $0x34] sm:$0xf] %vm1743_vm4, %v1720_v41  ;;  %v1630_v49 = vmax.f32 %v1482_v44, %v1554_v47 }
 0x139   :  { %v1693_v50 = vmax.f32 %v1657_v46, 0.0  ;;  %1153 = vst.msk [vmem:[#allocation2 + $0xa8] sm:$0xff] %vm1131_vm3, %v824_v40  ;;  %v1003_v51 = vpop.f32.mrf.mxu2  ;;  %v1093_v52 = vpop.f32.mrf.mxu3 }
 0x13a   :  { %v1666_v53 = vmax.f32 %v1594_v48, %v1630_v49  ;;  %1189 = vst.msk [vmem:[#allocation2 + $0x1c8] sm:$0xff] %vm1131_vm3, %v914_v45  ;;  %v1004_v54 = vadd.f32 %v2793_v39, %v1003_v51  ;;  %v1094_v55 = vadd.f32 %v2793_v39, %v1093_v52  ;;  %v826_v56 = vpop.f32.mrf.mxu0  ;;  %v916_v57 = vpop.f32.mrf.mxu1 }
 0x13b   :  { %v1729_v58 = vpack.c.bf16 %v1693_v50, %v1693_v50  ;;  %v827_v59 = vadd.f32 %v2793_v39, %v826_v56  ;;  %v917_v61 = vadd.f32 %v2793_v39, %v916_v57 }
 0x13c   :  { %v1702_v60 = vmax.f32 %v1666_v53, 0.0  ;;  %1225 = vst.msk [vmem:[#allocation2 + $0x2e8] sm:$0xff] %vm1131_vm3, %v1004_v54 }
 0x13d   :  { %1766 = vst.msk [vmem:[%s2998_s3 + $0x58] sm:$0xf] %vm1743_vm4, %v1729_v58 }
 0x13e   :  { %v1738_v62 = vpack.c.bf16 %v1702_v60, %v1702_v60  ;;  %1261 = vst.msk [vmem:[#allocation2 + $0x408] sm:$0xff] %vm1131_vm3, %v1094_v55 }
 0x13f   :  { %1154 = vst.msk [vmem:[#allocation2 + $0xb0] sm:$0xff] %vm1131_vm3, %v827_v59 }
 0x140   :  { %1775 = vst.msk [vmem:[%s2998_s3 + $0x7c] sm:$0xf] %vm1743_vm4, %v1738_v62 }
 0x141   :  { %1190 = vst.msk [vmem:[#allocation2 + $0x1d0] sm:$0xff] %vm1131_vm3, %v917_v61  ;;  %v1006_v63 = vpop.f32.mrf.mxu2  ;;  %v1096_v0 = vpop.f32.mrf.mxu3 }
 0x142   :  { %v1007_v1 = vadd.f32 %v2793_v39, %v1006_v63  ;;  %v1097_v2 = vadd.f32 %v2793_v39, %v1096_v0  ;;  %v828_v3 = vpop.f32.mrf.mxu0  ;;  %v918_v4 = vpop.f32.mrf.mxu1 }
 0x143   :  { %v829_v5 = vadd.f32 %v2793_v39, %v828_v3  ;;  %v919_v6 = vadd.f32 %v2793_v39, %v918_v4 }
 0x144   :  { %1226 = vst.msk [vmem:[#allocation2 + $0x2f0] sm:$0xff] %vm1131_vm3, %v1007_v1 }
 0x145   :  { %1262 = vst.msk [vmem:[#allocation2 + $0x410] sm:$0xff] %vm1131_vm3, %v1097_v2 }
 0x146   :  { %1155 = vst.msk [vmem:[#allocation2 + $0xb8] sm:$0xff] %vm1131_vm3, %v829_v5 }
 0x147   :  { %1191 = vst.msk [vmem:[#allocation2 + $0x1d8] sm:$0xff] %vm1131_vm3, %v919_v6 }
 0x149   :  { %v1008_v7 = vpop.f32.mrf.mxu2  ;;  %v1098_v8 = vpop.f32.mrf.mxu3 }
 0x14a   :  { %v1009_v9 = vadd.f32 %v2793_v39, %v1008_v7  ;;  %v831_v10 = vpop.f32.mrf.mxu0  ;;  %v921_v11 = vpop.f32.mrf.mxu1  ;;  %v1099_v12 = vadd.f32 %v2793_v39, %v1098_v8 }
 0x14b   :  { %v832_v13 = vadd.f32 %v2793_v39, %v831_v10  ;;  %v922_v17 = vadd.f32 %v2793_v39, %v921_v11 }
 0x14c   :  { %1227 = vst.msk [vmem:[#allocation2 + $0x2f8] sm:$0xff] %vm1131_vm3, %v1009_v9 }
 0x14d   :  { %v1286_v14 = vld [vmem:[#allocation2 + $0xa0] ss:$4 sm:$0xff]  ;;  %v1358_v15 = vld [vmem:[#allocation2 + $0xa1] ss:$4 sm:$0xff]  ;;  %v1430_v16 = vld [vmem:[#allocation2 + $0xa2] ss:$4 sm:$0xff] }
 0x14e   :  { %v1502_v18 = vld [vmem:[#allocation2 + $0xa3] ss:$4 sm:$0xff]  ;;  %v1568_v19 = vmax.f32 %v1286_v14, %v1358_v15  ;;  %v1304_v20 = vld [vmem:[#allocation2 + $0x1c0] ss:$4 sm:$0xff]  ;;  %v1376_v21 = vld [vmem:[#allocation2 + $0x1c1] ss:$4 sm:$0xff] }
 0x14f   :  { %v1604_v22 = vmax.f32 %v1430_v16, %v1502_v18  ;;  %v1448_v23 = vld [vmem:[#allocation2 + $0x1c2] ss:$4 sm:$0xff]  ;;  %v1520_v24 = vld [vmem:[#allocation2 + $0x1c3] ss:$4 sm:$0xff]  ;;  %v1577_v25 = vmax.f32 %v1304_v20, %v1376_v21  ;;  %1263 = vst.msk [vmem:[#allocation2 + $0x418] sm:$0xff] %vm1131_vm3, %v1099_v12 }
 0x150   :  { %v1613_v26 = vmax.f32 %v1448_v23, %v1520_v24  ;;  %1156 = vst.msk [vmem:[#allocation2 + $0xc0] sm:$0xff] %vm1131_vm3, %v832_v13 }
 0x151   :  { %v1640_v27 = vmax.f32 %v1568_v19, %v1604_v22  ;;  %1192 = vst.msk [vmem:[#allocation2 + $0x1e0] sm:$0xff] %vm1131_vm3, %v922_v17  ;;  %v1011_v28 = vpop.f32.mrf.mxu2  ;;  %v1101_v29 = vpop.f32.mrf.mxu3 }
 0x152   :  { %v1649_v30 = vmax.f32 %v1577_v25, %v1613_v26  ;;  %v1012_v31 = vadd.f32 %v2793_v39, %v1011_v28  ;;  %v1102_v32 = vadd.f32 %v2793_v39, %v1101_v29  ;;  %v833_v33 = vpop.f32.mrf.mxu0  ;;  %v923_v34 = vpop.f32.mrf.mxu1 }
 0x153   :  { %v1676_v35 = vmax.f32 %v1640_v27, 0.0  ;;  %v1322_v36 = vld [vmem:[#allocation2 + $0x2e0] ss:$4 sm:$0xff]  ;;  %v1394_v37 = vld [vmem:[#allocation2 + $0x2e1] ss:$4 sm:$0xff]  ;;  %v834_v45 = vadd.f32 %v2793_v39, %v833_v33  ;;  %v924_v50 = vadd.f32 %v2793_v39, %v923_v34 }
 0x154   :  { %v1685_v38 = vmax.f32 %v1649_v30, 0.0  ;;  %v1466_v40 = vld [vmem:[#allocation2 + $0x2e2] ss:$4 sm:$0xff]  ;;  %v1538_v41 = vld [vmem:[#allocation2 + $0x2e3] ss:$4 sm:$0xff]  ;;  %v1586_v42 = vmax.f32 %v1322_v36, %v1394_v37  ;;  %1228 = vst.msk [vmem:[#allocation2 + $0x300] sm:$0xff] %vm1131_vm3, %v1012_v31 }
 0x155   :  { %v1712_v43 = vpack.c.bf16 %v1676_v35, %v1676_v35  ;;  %v1622_v44 = vmax.f32 %v1466_v40, %v1538_v41  ;;  %1264 = vst.msk [vmem:[#allocation2 + $0x420] sm:$0xff] %vm1131_vm3, %v1102_v32 }
 0x156   :  { %v1721_v46 = vpack.c.bf16 %v1685_v38, %v1685_v38  ;;  %v1340_v47 = vld [vmem:[#allocation2 + $0x400] ss:$4 sm:$0xff]  ;;  %v1412_v48 = vld [vmem:[#allocation2 + $0x401] ss:$4 sm:$0xff]  ;;  %v1484_v49 = vld [vmem:[#allocation2 + $0x402] ss:$4 sm:$0xff] }
 0x157   :  { %1749 = vst.msk [vmem:[%s2998_s3 + $0x14] sm:$0xf] %vm1743_vm4, %v1712_v43  ;;  %v1658_v51 = vmax.f32 %v1586_v42, %v1622_v44  ;;  %v1556_v52 = vld [vmem:[#allocation2 + $0x403] ss:$4 sm:$0xff]  ;;  %v1595_v53 = vmax.f32 %v1340_v47, %v1412_v48 }
 0x158   :  { %1758 = vst.msk [vmem:[%s2998_s3 + $0x38] sm:$0xf] %vm1743_vm4, %v1721_v46  ;;  %v1631_v54 = vmax.f32 %v1484_v49, %v1556_v52 }
 0x159   :  { %v1694_v55 = vmax.f32 %v1658_v51, 0.0  ;;  %1157 = vst.msk [vmem:[#allocation2 + $0xc8] sm:$0xff] %vm1131_vm3, %v834_v45  ;;  %v1013_v56 = vpop.f32.mrf.mxu2  ;;  %v1103_v57 = vpop.f32.mrf.mxu3 }
 0x15a   :  { %v1667_v58 = vmax.f32 %v1595_v53, %v1631_v54  ;;  %1193 = vst.msk [vmem:[#allocation2 + $0x1e8] sm:$0xff] %vm1131_vm3, %v924_v50  ;;  %v1014_v59 = vadd.f32 %v2793_v39, %v1013_v56  ;;  %v1104_v60 = vadd.f32 %v2793_v39, %v1103_v57  ;;  %v836_v61 = vpop.f32.mrf.mxu0  ;;  %v926_v62 = vpop.f32.mrf.mxu1 }
 0x15b   :  { %v1730_v63 = vpack.c.bf16 %v1694_v55, %v1694_v55  ;;  %v837_v0 = vadd.f32 %v2793_v39, %v836_v61  ;;  %v927_v2 = vadd.f32 %v2793_v39, %v926_v62 }
 0x15c   :  { %v1703_v1 = vmax.f32 %v1667_v58, 0.0  ;;  %1229 = vst.msk [vmem:[#allocation2 + $0x308] sm:$0xff] %vm1131_vm3, %v1014_v59 }
 0x15d   :  { %1767 = vst.msk [vmem:[%s2998_s3 + $0x5c] sm:$0xf] %vm1743_vm4, %v1730_v63 }
 0x15e   :  { %v1739_v3 = vpack.c.bf16 %v1703_v1, %v1703_v1  ;;  %1265 = vst.msk [vmem:[#allocation2 + $0x428] sm:$0xff] %vm1131_vm3, %v1104_v60 }
 0x15f   :  { %1158 = vst.msk [vmem:[#allocation2 + $0xd0] sm:$0xff] %vm1131_vm3, %v837_v0 }
 0x160   :  { %1776 = vst.msk [vmem:[%s2998_s3 + $0x80] sm:$0xf] %vm1743_vm4, %v1739_v3 }
 0x161   :  { %1194 = vst.msk [vmem:[#allocation2 + $0x1f0] sm:$0xff] %vm1131_vm3, %v927_v2  ;;  %v1016_v4 = vpop.f32.mrf.mxu2  ;;  %v1106_v5 = vpop.f32.mrf.mxu3 }
 0x162   :  { %v1017_v6 = vadd.f32 %v2793_v39, %v1016_v4  ;;  %v1107_v7 = vadd.f32 %v2793_v39, %v1106_v5  ;;  %v838_v8 = vpop.f32.mrf.mxu0  ;;  %v928_v9 = vpop.f32.mrf.mxu1 }
 0x163   :  { %v839_v10 = vadd.f32 %v2793_v39, %v838_v8  ;;  %v929_v11 = vadd.f32 %v2793_v39, %v928_v9 }
 0x164   :  { %1230 = vst.msk [vmem:[#allocation2 + $0x310] sm:$0xff] %vm1131_vm3, %v1017_v6 }
 0x165   :  { %1266 = vst.msk [vmem:[#allocation2 + $0x430] sm:$0xff] %vm1131_vm3, %v1107_v7 }
 0x166   :  { %1159 = vst.msk [vmem:[#allocation2 + $0xd8] sm:$0xff] %vm1131_vm3, %v839_v10 }
 0x167   :  { %1195 = vst.msk [vmem:[#allocation2 + $0x1f8] sm:$0xff] %vm1131_vm3, %v929_v11 }
 0x169   :  { %v1018_v12 = vpop.f32.mrf.mxu2  ;;  %v1108_v13 = vpop.f32.mrf.mxu3 }
 0x16a   :  { %v1019_v14 = vadd.f32 %v2793_v39, %v1018_v12  ;;  %v841_v15 = vpop.f32.mrf.mxu0  ;;  %v931_v16 = vpop.f32.mrf.mxu1  ;;  %v1109_v17 = vadd.f32 %v2793_v39, %v1108_v13 }
 0x16b   :  { %v842_v18 = vadd.f32 %v2793_v39, %v841_v15  ;;  %v932_v22 = vadd.f32 %v2793_v39, %v931_v16 }
 0x16c   :  { %1231 = vst.msk [vmem:[#allocation2 + $0x318] sm:$0xff] %vm1131_vm3, %v1019_v14 }
 0x16d   :  { %v1288_v19 = vld [vmem:[#allocation2 + $0xc0] ss:$4 sm:$0xff]  ;;  %v1360_v20 = vld [vmem:[#allocation2 + $0xc1] ss:$4 sm:$0xff]  ;;  %v1432_v21 = vld [vmem:[#allocation2 + $0xc2] ss:$4 sm:$0xff] }
 0x16e   :  { %v1504_v23 = vld [vmem:[#allocation2 + $0xc3] ss:$4 sm:$0xff]  ;;  %v1569_v24 = vmax.f32 %v1288_v19, %v1360_v20  ;;  %v1306_v25 = vld [vmem:[#allocation2 + $0x1e0] ss:$4 sm:$0xff]  ;;  %v1378_v26 = vld [vmem:[#allocation2 + $0x1e1] ss:$4 sm:$0xff] }
 0x16f   :  { %v1605_v27 = vmax.f32 %v1432_v21, %v1504_v23  ;;  %v1450_v28 = vld [vmem:[#allocation2 + $0x1e2] ss:$4 sm:$0xff]  ;;  %v1522_v29 = vld [vmem:[#allocation2 + $0x1e3] ss:$4 sm:$0xff]  ;;  %v1578_v30 = vmax.f32 %v1306_v25, %v1378_v26  ;;  %1267 = vst.msk [vmem:[#allocation2 + $0x438] sm:$0xff] %vm1131_vm3, %v1109_v17 }
 0x170   :  { %v1614_v31 = vmax.f32 %v1450_v28, %v1522_v29  ;;  %1160 = vst.msk [vmem:[#allocation2 + $0xe0] sm:$0xff] %vm1131_vm3, %v842_v18 }
 0x171   :  { %v1641_v32 = vmax.f32 %v1569_v24, %v1605_v27  ;;  %1196 = vst.msk [vmem:[#allocation2 + $0x200] sm:$0xff] %vm1131_vm3, %v932_v22  ;;  %v1021_v33 = vpop.f32.mrf.mxu2  ;;  %v1111_v34 = vpop.f32.mrf.mxu3 }
 0x172   :  { %v1650_v35 = vmax.f32 %v1578_v30, %v1614_v31  ;;  %v1022_v36 = vadd.f32 %v2793_v39, %v1021_v33  ;;  %v1112_v37 = vadd.f32 %v2793_v39, %v1111_v34  ;;  %v843_v38 = vpop.f32.mrf.mxu0  ;;  %v933_v40 = vpop.f32.mrf.mxu1 }
 0x173   :  { %v1677_v41 = vmax.f32 %v1641_v32, 0.0  ;;  %v1324_v42 = vld [vmem:[#allocation2 + $0x300] ss:$4 sm:$0xff]  ;;  %v1396_v43 = vld [vmem:[#allocation2 + $0x301] ss:$4 sm:$0xff]  ;;  %v844_v50 = vadd.f32 %v2793_v39, %v843_v38  ;;  %v934_v55 = vadd.f32 %v2793_v39, %v933_v40 }
 0x174   :  { %v1686_v44 = vmax.f32 %v1650_v35, 0.0  ;;  %v1468_v45 = vld [vmem:[#allocation2 + $0x302] ss:$4 sm:$0xff]  ;;  %v1540_v46 = vld [vmem:[#allocation2 + $0x303] ss:$4 sm:$0xff]  ;;  %v1587_v47 = vmax.f32 %v1324_v42, %v1396_v43  ;;  %1232 = vst.msk [vmem:[#allocation2 + $0x320] sm:$0xff] %vm1131_vm3, %v1022_v36 }
 0x175   :  { %v1713_v48 = vpack.c.bf16 %v1677_v41, %v1677_v41  ;;  %v1623_v49 = vmax.f32 %v1468_v45, %v1540_v46  ;;  %1268 = vst.msk [vmem:[#allocation2 + $0x440] sm:$0xff] %vm1131_vm3, %v1112_v37 }
 0x176   :  { %v1722_v51 = vpack.c.bf16 %v1686_v44, %v1686_v44  ;;  %v1342_v52 = vld [vmem:[#allocation2 + $0x420] ss:$4 sm:$0xff]  ;;  %v1414_v53 = vld [vmem:[#allocation2 + $0x421] ss:$4 sm:$0xff]  ;;  %v1486_v54 = vld [vmem:[#allocation2 + $0x422] ss:$4 sm:$0xff] }
 0x177   :  { %1750 = vst.msk [vmem:[%s2998_s3 + $0x18] sm:$0xf] %vm1743_vm4, %v1713_v48  ;;  %v1659_v56 = vmax.f32 %v1587_v47, %v1623_v49  ;;  %v1558_v57 = vld [vmem:[#allocation2 + $0x423] ss:$4 sm:$0xff]  ;;  %v1596_v58 = vmax.f32 %v1342_v52, %v1414_v53 }
 0x178   :  { %1759 = vst.msk [vmem:[%s2998_s3 + $0x3c] sm:$0xf] %vm1743_vm4, %v1722_v51  ;;  %v1632_v59 = vmax.f32 %v1486_v54, %v1558_v57 }
 0x179   :  { %v1695_v60 = vmax.f32 %v1659_v56, 0.0  ;;  %1161 = vst.msk [vmem:[#allocation2 + $0xe8] sm:$0xff] %vm1131_vm3, %v844_v50  ;;  %v1023_v61 = vpop.f32.mrf.mxu2  ;;  %v1113_v62 = vpop.f32.mrf.mxu3 }
 0x17a   :  { %v1668_v63 = vmax.f32 %v1596_v58, %v1632_v59  ;;  %1197 = vst.msk [vmem:[#allocation2 + $0x208] sm:$0xff] %vm1131_vm3, %v934_v55  ;;  %v1024_v0 = vadd.f32 %v2793_v39, %v1023_v61  ;;  %v1114_v1 = vadd.f32 %v2793_v39, %v1113_v62  ;;  %v846_v2 = vpop.f32.mrf.mxu0  ;;  %v936_v3 = vpop.f32.mrf.mxu1 }
 0x17b   :  { %v1731_v4 = vpack.c.bf16 %v1695_v60, %v1695_v60  ;;  %v847_v5 = vadd.f32 %v2793_v39, %v846_v2  ;;  %v937_v7 = vadd.f32 %v2793_v39, %v936_v3 }
 0x17c   :  { %v1704_v6 = vmax.f32 %v1668_v63, 0.0  ;;  %1233 = vst.msk [vmem:[#allocation2 + $0x328] sm:$0xff] %vm1131_vm3, %v1024_v0 }
 0x17d   :  { %1768 = vst.msk [vmem:[%s2998_s3 + $0x60] sm:$0xf] %vm1743_vm4, %v1731_v4 }
 0x17e   :  { %v1740_v8 = vpack.c.bf16 %v1704_v6, %v1704_v6  ;;  %1269 = vst.msk [vmem:[#allocation2 + $0x448] sm:$0xff] %vm1131_vm3, %v1114_v1 }
 0x17f   :  { %1162 = vst.msk [vmem:[#allocation2 + $0xf0] sm:$0xff] %vm1131_vm3, %v847_v5 }
 0x180   :  { %1777 = vst.msk [vmem:[%s2998_s3 + $0x84] sm:$0xf] %vm1743_vm4, %v1740_v8 }
 0x181   :  { %1198 = vst.msk [vmem:[#allocation2 + $0x210] sm:$0xff] %vm1131_vm3, %v937_v7  ;;  %v1026_v9 = vpop.f32.mrf.mxu2  ;;  %v1116_v10 = vpop.f32.mrf.mxu3 }
 0x182   :  { %v1027_v11 = vadd.f32 %v2793_v39, %v1026_v9  ;;  %v1117_v12 = vadd.f32 %v2793_v39, %v1116_v10  ;;  %v848_v13 = vpop.f32.mrf.mxu0  ;;  %v938_v14 = vpop.f32.mrf.mxu1 }
 0x183   :  { %v849_v15 = vadd.f32 %v2793_v39, %v848_v13  ;;  %v939_v16 = vadd.f32 %v2793_v39, %v938_v14 }
 0x184   :  { %1234 = vst.msk [vmem:[#allocation2 + $0x330] sm:$0xff] %vm1131_vm3, %v1027_v11 }
 0x185   :  { %1270 = vst.msk [vmem:[#allocation2 + $0x450] sm:$0xff] %vm1131_vm3, %v1117_v12 }
 0x186   :  { %1163 = vst.msk [vmem:[#allocation2 + $0xf8] sm:$0xff] %vm1131_vm3, %v849_v15 }
 0x187   :  { %1199 = vst.msk [vmem:[#allocation2 + $0x218] sm:$0xff] %vm1131_vm3, %v939_v16 }
 0x189   :  { %v1028_v17 = vpop.f32.mrf.mxu2  ;;  %v1118_v18 = vpop.f32.mrf.mxu3 }
 0x18a   :  { %v1029_v19 = vadd.f32 %v2793_v39, %v1028_v17  ;;  %v851_v20 = vpop.f32.mrf.mxu0  ;;  %v941_v21 = vpop.f32.mrf.mxu1  ;;  %v1119_v22 = vadd.f32 %v2793_v39, %v1118_v18 }
 0x18b   :  { %v852_v23 = vadd.f32 %v2793_v39, %v851_v20  ;;  %v942_v27 = vadd.f32 %v2793_v39, %v941_v21 }
 0x18c   :  { %1235 = vst.msk [vmem:[#allocation2 + $0x338] sm:$0xff] %vm1131_vm3, %v1029_v19 }
 0x18d   :  { %v1290_v24 = vld [vmem:[#allocation2 + $0xe0] ss:$4 sm:$0xff]  ;;  %v1362_v25 = vld [vmem:[#allocation2 + $0xe1] ss:$4 sm:$0xff]  ;;  %v1434_v26 = vld [vmem:[#allocation2 + $0xe2] ss:$4 sm:$0xff] }
 0x18e   :  { %v1506_v28 = vld [vmem:[#allocation2 + $0xe3] ss:$4 sm:$0xff]  ;;  %v1570_v29 = vmax.f32 %v1290_v24, %v1362_v25  ;;  %v1308_v30 = vld [vmem:[#allocation2 + $0x200] ss:$4 sm:$0xff]  ;;  %v1380_v31 = vld [vmem:[#allocation2 + $0x201] ss:$4 sm:$0xff] }
 0x18f   :  { %v1606_v32 = vmax.f32 %v1434_v26, %v1506_v28  ;;  %v1452_v33 = vld [vmem:[#allocation2 + $0x202] ss:$4 sm:$0xff]  ;;  %v1524_v34 = vld [vmem:[#allocation2 + $0x203] ss:$4 sm:$0xff]  ;;  %v1579_v35 = vmax.f32 %v1308_v30, %v1380_v31  ;;  %1271 = vst.msk [vmem:[#allocation2 + $0x458] sm:$0xff] %vm1131_vm3, %v1119_v22 }
 0x190   :  { %v1615_v36 = vmax.f32 %v1452_v33, %v1524_v34  ;;  %1164 = vst.msk [vmem:[#allocation2 + $0x100] sm:$0xff] %vm1131_vm3, %v852_v23 }
 0x191   :  { %v1642_v37 = vmax.f32 %v1570_v29, %v1606_v32  ;;  %1200 = vst.msk [vmem:[#allocation2 + $0x220] sm:$0xff] %vm1131_vm3, %v942_v27  ;;  %v1031_v38 = vpop.f32.mrf.mxu2  ;;  %v1121_v40 = vpop.f32.mrf.mxu3 }
 0x192   :  { %v1651_v41 = vmax.f32 %v1579_v35, %v1615_v36  ;;  %v1032_v42 = vadd.f32 %v2793_v39, %v1031_v38  ;;  %v1122_v43 = vadd.f32 %v2793_v39, %v1121_v40  ;;  %v853_v44 = vpop.f32.mrf.mxu0  ;;  %v943_v45 = vpop.f32.mrf.mxu1 }
 0x193   :  { %v1678_v46 = vmax.f32 %v1642_v37, 0.0  ;;  %v1326_v47 = vld [vmem:[#allocation2 + $0x320] ss:$4 sm:$0xff]  ;;  %v1398_v48 = vld [vmem:[#allocation2 + $0x321] ss:$4 sm:$0xff]  ;;  %v854_v55 = vadd.f32 %v2793_v39, %v853_v44  ;;  %v944_v60 = vadd.f32 %v2793_v39, %v943_v45 }
 0x194   :  { %v1687_v49 = vmax.f32 %v1651_v41, 0.0  ;;  %v1470_v50 = vld [vmem:[#allocation2 + $0x322] ss:$4 sm:$0xff]  ;;  %v1542_v51 = vld [vmem:[#allocation2 + $0x323] ss:$4 sm:$0xff]  ;;  %v1588_v52 = vmax.f32 %v1326_v47, %v1398_v48  ;;  %1236 = vst.msk [vmem:[#allocation2 + $0x340] sm:$0xff] %vm1131_vm3, %v1032_v42 }
 0x195   :  { %v1714_v53 = vpack.c.bf16 %v1678_v46, %v1678_v46  ;;  %v1624_v54 = vmax.f32 %v1470_v50, %v1542_v51  ;;  %1272 = vst.msk [vmem:[#allocation2 + $0x460] sm:$0xff] %vm1131_vm3, %v1122_v43 }
 0x196   :  { %v1723_v56 = vpack.c.bf16 %v1687_v49, %v1687_v49  ;;  %v1344_v57 = vld [vmem:[#allocation2 + $0x440] ss:$4 sm:$0xff]  ;;  %v1416_v58 = vld [vmem:[#allocation2 + $0x441] ss:$4 sm:$0xff]  ;;  %v1488_v59 = vld [vmem:[#allocation2 + $0x442] ss:$4 sm:$0xff] }
 0x197   :  { %1751 = vst.msk [vmem:[%s2998_s3 + $0x1c] sm:$0xf] %vm1743_vm4, %v1714_v53  ;;  %v1660_v61 = vmax.f32 %v1588_v52, %v1624_v54  ;;  %v1560_v62 = vld [vmem:[#allocation2 + $0x443] ss:$4 sm:$0xff]  ;;  %v1597_v63 = vmax.f32 %v1344_v57, %v1416_v58 }
 0x198   :  { %1760 = vst.msk [vmem:[%s2998_s3 + $0x40] sm:$0xf] %vm1743_vm4, %v1723_v56  ;;  %v1633_v0 = vmax.f32 %v1488_v59, %v1560_v62 }
 0x199   :  { %v1696_v1 = vmax.f32 %v1660_v61, 0.0  ;;  %1165 = vst.msk [vmem:[#allocation2 + $0x108] sm:$0xff] %vm1131_vm3, %v854_v55  ;;  %v1033_v2 = vpop.f32.mrf.mxu2  ;;  %v1123_v3 = vpop.f32.mrf.mxu3 }
 0x19a   :  { %v1669_v4 = vmax.f32 %v1597_v63, %v1633_v0  ;;  %1201 = vst.msk [vmem:[#allocation2 + $0x228] sm:$0xff] %vm1131_vm3, %v944_v60  ;;  %v1034_v5 = vadd.f32 %v2793_v39, %v1033_v2  ;;  %v1124_v6 = vadd.f32 %v2793_v39, %v1123_v3  ;;  %v856_v7 = vpop.f32.mrf.mxu0  ;;  %v946_v8 = vpop.f32.mrf.mxu1 }
 0x19b   :  { %v1732_v9 = vpack.c.bf16 %v1696_v1, %v1696_v1  ;;  %v857_v10 = vadd.f32 %v2793_v39, %v856_v7  ;;  %v947_v12 = vadd.f32 %v2793_v39, %v946_v8 }
 0x19c   :  { %v1705_v11 = vmax.f32 %v1669_v4, 0.0  ;;  %1237 = vst.msk [vmem:[#allocation2 + $0x348] sm:$0xff] %vm1131_vm3, %v1034_v5 }
 0x19d   :  { %1769 = vst.msk [vmem:[%s2998_s3 + $0x64] sm:$0xf] %vm1743_vm4, %v1732_v9 }
 0x19e   :  { %v1741_v13 = vpack.c.bf16 %v1705_v11, %v1705_v11  ;;  %1273 = vst.msk [vmem:[#allocation2 + $0x468] sm:$0xff] %vm1131_vm3, %v1124_v6 }
 0x19f   :  { %1166 = vst.msk [vmem:[#allocation2 + $0x110] sm:$0xff] %vm1131_vm3, %v857_v10 }
 0x1a0   :  { %1778 = vst.msk [vmem:[%s2998_s3 + $0x88] sm:$0xf] %vm1743_vm4, %v1741_v13 }
 0x1a1   :  { %1202 = vst.msk [vmem:[#allocation2 + $0x230] sm:$0xff] %vm1131_vm3, %v947_v12  ;;  %v1036_v14 = vpop.f32.mrf.mxu2  ;;  %v1126_v15 = vpop.f32.mrf.mxu3 }
 0x1a2   :  { %v1037_v16 = vadd.f32 %v2793_v39, %v1036_v14  ;;  %v1127_v17 = vadd.f32 %v2793_v39, %v1126_v15  ;;  %v858_v18 = vpop.f32.mrf.mxu0  ;;  %v948_v19 = vpop.f32.mrf.mxu1 }
 0x1a3   :  { %v859_v20 = vadd.f32 %v2793_v39, %v858_v18  ;;  %v949_v21 = vadd.f32 %v2793_v39, %v948_v19 }
 0x1a4   :  { %1238 = vst.msk [vmem:[#allocation2 + $0x350] sm:$0xff] %vm1131_vm3, %v1037_v16 }
 0x1a5   :  { %1274 = vst.msk [vmem:[#allocation2 + $0x470] sm:$0xff] %vm1131_vm3, %v1127_v17 }
 0x1a6   :  { %1167 = vst.msk [vmem:[#allocation2 + $0x118] sm:$0xff] %vm1131_vm3, %v859_v20 }
 0x1a7   :  { %1203 = vst.msk [vmem:[#allocation2 + $0x238] sm:$0xff] %vm1131_vm3, %v949_v21 }
 0x1a9   :  { %v1038_v22 = vpop.f32.mrf.mxu2  ;;  %v1128_v23 = vpop.f32.mrf.mxu3 }
 0x1aa   :  { %v1039_v24 = vadd.f32 %v2793_v39, %v1038_v22  ;;  %v1129_v25 = vadd.f32 %v2793_v39, %v1128_v23 }
 0x1ac   :  { %1239 = vst.msk [vmem:[#allocation2 + $0x358] sm:$0xff] %vm1131_vm3, %v1039_v24 }
 0x1ad   :  { %v1292_v26 = vld [vmem:[#allocation2 + $0x100] ss:$4 sm:$0xff]  ;;  %v1364_v27 = vld [vmem:[#allocation2 + $0x101] ss:$4 sm:$0xff]  ;;  %v1436_v28 = vld [vmem:[#allocation2 + $0x102] ss:$4 sm:$0xff] }
 0x1ae   :  { %v1508_v29 = vld [vmem:[#allocation2 + $0x103] ss:$4 sm:$0xff]  ;;  %v1571_v30 = vmax.f32 %v1292_v26, %v1364_v27  ;;  %v1310_v31 = vld [vmem:[#allocation2 + $0x220] ss:$4 sm:$0xff]  ;;  %v1382_v32 = vld [vmem:[#allocation2 + $0x221] ss:$4 sm:$0xff] }
 0x1af   :  { %v1607_v33 = vmax.f32 %v1436_v28, %v1508_v29  ;;  %v1454_v34 = vld [vmem:[#allocation2 + $0x222] ss:$4 sm:$0xff]  ;;  %v1526_v35 = vld [vmem:[#allocation2 + $0x223] ss:$4 sm:$0xff]  ;;  %v1580_v36 = vmax.f32 %v1310_v31, %v1382_v32  ;;  %1275 = vst.msk [vmem:[#allocation2 + $0x478] sm:$0xff] %vm1131_vm3, %v1129_v25 }
 0x1b0   :  { %v1616_v37 = vmax.f32 %v1454_v34, %v1526_v35 }
 0x1b1   :  { %v1643_v38 = vmax.f32 %v1571_v30, %v1607_v33 }
 0x1b2   :  { %v1652_v40 = vmax.f32 %v1580_v36, %v1616_v37 }
 0x1b3   :  { %v1679_v41 = vmax.f32 %v1643_v38, 0.0  ;;  %v1328_v39 = vld [vmem:[#allocation2 + $0x340] ss:$4 sm:$0xff]  ;;  %v1400_v42 = vld [vmem:[#allocation2 + $0x341] ss:$4 sm:$0xff] }
 0x1b4   :  { %v1688_v43 = vmax.f32 %v1652_v40, 0.0  ;;  %v1472_v44 = vld [vmem:[#allocation2 + $0x342] ss:$4 sm:$0xff]  ;;  %v1544_v45 = vld [vmem:[#allocation2 + $0x343] ss:$4 sm:$0xff]  ;;  %v1589_v46 = vmax.f32 %v1328_v39, %v1400_v42 }
 0x1b5   :  { %v1715_v47 = vpack.c.bf16 %v1679_v41, %v1679_v41  ;;  %v1625_v48 = vmax.f32 %v1472_v44, %v1544_v45 }
 0x1b6   :  { %v1724_v49 = vpack.c.bf16 %v1688_v43, %v1688_v43  ;;  %v1346_v50 = vld [vmem:[#allocation2 + $0x460] ss:$4 sm:$0xff]  ;;  %v1418_v51 = vld [vmem:[#allocation2 + $0x461] ss:$4 sm:$0xff]  ;;  %v1490_v52 = vld [vmem:[#allocation2 + $0x462] ss:$4 sm:$0xff] }
 0x1b7   :  { %1752 = vst.msk [vmem:[%s2998_s3 + $0x20] sm:$0xf] %vm1743_vm4, %v1715_v47  ;;  %v1661_v53 = vmax.f32 %v1589_v46, %v1625_v48  ;;  %v1562_v54 = vld [vmem:[#allocation2 + $0x463] ss:$4 sm:$0xff]  ;;  %v1598_v55 = vmax.f32 %v1346_v50, %v1418_v51 }
 0x1b8   :  { %1761 = vst.msk [vmem:[%s2998_s3 + $0x44] sm:$0xf] %vm1743_vm4, %v1724_v49  ;;  %v1634_v56 = vmax.f32 %v1490_v52, %v1562_v54 }
 0x1b9   :  { %v1697_v57 = vmax.f32 %v1661_v53, 0.0 }
 0x1ba   :  { %v1670_v58 = vmax.f32 %v1598_v55, %v1634_v56 }
 0x1bb   :  { %v1733_v59 = vpack.c.bf16 %v1697_v57, %v1697_v57 }
 0x1bc   :  { %v1706_v60 = vmax.f32 %v1670_v58, 0.0 }
 0x1bd   :  { %1770 = vst.msk [vmem:[%s2998_s3 + $0x68] sm:$0xf] %vm1743_vm4, %v1733_v59 }
 0x1be   :  { %v1742_v61 = vpack.c.bf16 %v1706_v60, %v1706_v60 }
 0x1c0   :  { %1779 = vst.msk [vmem:[%s2998_s3 + $0x8c] sm:$0xf] %vm1743_vm4, %v1742_v61 }

// kernel: net_forward.4
= control target key start
LH: loop header
LB: loop body
LE: loop exit
PB: predicated region body
PF: predicated region fallthrough
CT: control target
= control target key end

     0   :  { %vm258_vm0 = vcmask 1044480   ;;  %vm233_vm1 = vcmask 998400   ;;  %vm360_vm2 = vcmask 162816   ;;  %vm428_vm3 = vcmask 158720   ;;  %s850_s1 = inlined_call_operand.vmem [shape: bf16[250,20], index: 1, kind: input, shape index: {}]   ;;  %s851_s2 = inlined_call_operand.vmem [shape: f32[1,20], index: 2, kind: input, shape index: {}]   ;;  %s852_s0 = inlined_call_operand.vmem [shape: bf16[128,250], index: 0, kind: input, shape index: {}]   ;;  %s853_s3 = inlined_call_operand.vmem [shape: bf16[32,20], index: 3, kind: output, shape index: {}]  }
   0x1   :  { %v596_v0 = vld [vmem:[%s850_s1 + $0x38] sm:$0xff]  ;;  %v595_v4 = vld [vmem:[%s850_s1 + $0x30] sm:$0xff]  ;;  %v594_v7 = vld [vmem:[%s850_s1 + $0x28] sm:$0xff] }
   0x2   :  { %v563_v1 = vld [vmem:[%s850_s1 + $0x78] sm:$0xf]  ;;  %v604_v2 = vld [vmem:[%s850_s1 + $0x78] sm:$0x10]  ;;  %262 = vmatpush.bf16.msra.mxu0 %v596_v0  ;;  %605 = vmatpush.bf16.msra.mxu2 %v596_v0  ;;  %v603_v6 = vld [vmem:[%s850_s1 + $0x70] sm:$0xff] }
   0x3   :  { %v564_v3 = vor.u32 %v604_v2, %v563_v1  ;;  %v602_v8 = vld [vmem:[%s850_s1 + $0x68] sm:$0xff]  ;;  %v593_v9 = vld [vmem:[%s850_s1 + $0x20] sm:$0xff]  ;;  %v592_v11 = vld [vmem:[%s850_s1 + $0x18] sm:$0xff] }
   0x4   :  { %v601_v10 = vld [vmem:[%s850_s1 + $0x60] sm:$0xff]  ;;  %v600_v12 = vld [vmem:[%s850_s1 + $0x58] sm:$0xff]  ;;  %v591_v13 = vld [vmem:[%s850_s1 + $0x10] sm:$0xff] }
   0x5   :  { %v260_v5 = vsel %vm258_vm0, %v564_v3, 0  ;;  %v599_v14 = vld [vmem:[%s850_s1 + $0x50] sm:$0xff]  ;;  %v590_v15 = vld [vmem:[%s850_s1 + $0x8] sm:$0xff]  ;;  %v589_v17 = vld [vmem:[%s850_s1] sm:$0xff] }
   0x6   :  { %311 = vmatpush.bf16.msra.mxu1 %v260_v5  ;;  %613 = vmatpush.bf16.msra.mxu3 %v260_v5  ;;  %v598_v16 = vld [vmem:[%s850_s1 + $0x48] sm:$0xff]  ;;  %v439_v18 = vld [vmem:[%s852_s0] sm:$0xf]  ;;  %v573_v23 = vld [vmem:[%s852_s0 + $0x4] sm:$0xf] }
   0x7   :  { %263 = vmatpush.bf16.msra.mxu0 %v595_v4  ;;  %606 = vmatpush.bf16.msra.mxu2 %v595_v4  ;;  %v574_v19 = vld [vmem:[%s852_s0 + $0x4] sm:$0xf0]  ;;  %v471_v20 = vld [vmem:[%s852_s0 + $0x40] sm:$0xf]  ;;  %v441_v24 = vld [vmem:[%s852_s0 + $0x8] sm:$0xf0] }
   0x8   :  { %v582_v21 = vld [vmem:[%s852_s0 + $0x44] sm:$0xf0]  ;;  %v597_v22 = vld [vmem:[%s850_s1 + $0x40] sm:$0xff]  ;;  %v473_v26 = vld [vmem:[%s852_s0 + $0x48] sm:$0xf0]  ;;  %v440_v27 = vor.u32 %v574_v19, %v439_v18  ;;  %v444_v29 = vor.u32 %v573_v23, %v441_v24 }
   0x9   :  { %v581_v25 = vld [vmem:[%s852_s0 + $0x44] sm:$0xf]  ;;  %v472_v28 = vor.u32 %v582_v21, %v471_v20  ;;  %v447_v31 = vld [vmem:[%s852_s0 + $0x10] sm:$0xf]  ;;  %v576_v32 = vld [vmem:[%s852_s0 + $0x14] sm:$0xf0] }
   0xa   :  { %312 = vmatpush.bf16.msra.mxu1 %v603_v6  ;;  %614 = vmatpush.bf16.msra.mxu3 %v603_v6  ;;  %v476_v30 = vor.u32 %v581_v25, %v473_v26  ;;  %v479_v33 = vld [vmem:[%s852_s0 + $0x50] sm:$0xf]  ;;  %v584_v34 = vld [vmem:[%s852_s0 + $0x54] sm:$0xf0]  ;;  %v575_v35 = vld [vmem:[%s852_s0 + $0x14] sm:$0xf]  ;;  %v448_v39 = vor.u32 %v576_v32, %v447_v31 }
   0xb   :  { %264 = vmatpush.bf16.msra.mxu0 %v594_v7  ;;  %607 = vmatpush.bf16.msra.mxu2 %v594_v7  ;;  %v449_v36 = vld [vmem:[%s852_s0 + $0x18] sm:$0xf0]  ;;  %v583_v37 = vld [vmem:[%s852_s0 + $0x54] sm:$0xf]  ;;  %v480_v40 = vor.u32 %v584_v34, %v479_v33  ;;  %v455_v43 = vld [vmem:[%s852_s0 + $0x20] sm:$0xf] }
   0xc   :  { %v481_v38 = vld [vmem:[%s852_s0 + $0x58] sm:$0xf0]  ;;  %v452_v41 = vor.u32 %v575_v35, %v449_v36  ;;  %v578_v44 = vld [vmem:[%s852_s0 + $0x24] sm:$0xf0]  ;;  %v487_v45 = vld [vmem:[%s852_s0 + $0x60] sm:$0xf] }
   0xd   :  { %v484_v42 = vor.u32 %v583_v37, %v481_v38  ;;  %v586_v46 = vld [vmem:[%s852_s0 + $0x64] sm:$0xf0]  ;;  %v577_v47 = vld [vmem:[%s852_s0 + $0x24] sm:$0xf]  ;;  %v457_v48 = vld [vmem:[%s852_s0 + $0x28] sm:$0xf0]  ;;  %v456_v51 = vor.u32 %v578_v44, %v455_v43 }
   0xe   :  { %313 = vmatpush.bf16.msra.mxu1 %v602_v8  ;;  %615 = vmatpush.bf16.msra.mxu3 %v602_v8  ;;  %v585_v49 = vld [vmem:[%s852_s0 + $0x64] sm:$0xf]  ;;  %v489_v50 = vld [vmem:[%s852_s0 + $0x68] sm:$0xf0]  ;;  %v488_v52 = vor.u32 %v586_v46, %v487_v45  ;;  %v460_v53 = vor.u32 %v577_v47, %v457_v48  ;;  %v463_v55 = vld [vmem:[%s852_s0 + $0x30] sm:$0xf] }
   0xf   :  { %265 = vmatpush.bf16.msra.mxu0 %v593_v9  ;;  %608 = vmatpush.bf16.msra.mxu2 %v593_v9  ;;  %v492_v54 = vor.u32 %v585_v49, %v489_v50  ;;  %v580_v56 = vld [vmem:[%s852_s0 + $0x34] sm:$0xf0]  ;;  %v495_v57 = vld [vmem:[%s852_s0 + $0x70] sm:$0xf]  ;;  %v579_v59 = vld [vmem:[%s852_s0 + $0x34] sm:$0xf] }
  0x10   :  { %v588_v58 = vld [vmem:[%s852_s0 + $0x74] sm:$0xf0]  ;;  %v465_v60 = vld [vmem:[%s852_s0 + $0x38] sm:$0xf0]  ;;  %v587_v61 = vld [vmem:[%s852_s0 + $0x74] sm:$0xf]  ;;  %v464_v63 = vor.u32 %v580_v56, %v463_v55 }
  0x11   :  { %v497_v62 = vld [vmem:[%s852_s0 + $0x78] sm:$0xf0]  ;;  %v496_v0 = vor.u32 %v588_v58, %v495_v57  ;;  %v468_v1 = vor.u32 %v579_v59, %v465_v60  ;;  %v800_v3 = vld [vmem:[%s851_s2] ss:$0 sm:$0xff] }
  0x12   :  { %314 = vmatpush.bf16.msra.mxu1 %v601_v10  ;;  %616 = vmatpush.bf16.msra.mxu3 %v601_v10  ;;  %v500_v2 = vor.u32 %v587_v61, %v497_v62 }
  0x13   :  { %266 = vmatpush.bf16.msra.mxu0 %v592_v11  ;;  %609 = vmatpush.bf16.msra.mxu2 %v592_v11 }
  0x16   :  { %315 = vmatpush.bf16.msra.mxu1 %v600_v12  ;;  %617 = vmatpush.bf16.msra.mxu3 %v600_v12 }
  0x17   :  { %267 = vmatpush.bf16.msra.mxu0 %v591_v13  ;;  %610 = vmatpush.bf16.msra.mxu2 %v591_v13 }
  0x1a   :  { %316 = vmatpush.bf16.msra.mxu1 %v599_v14  ;;  %618 = vmatpush.bf16.msra.mxu3 %v599_v14 }
  0x1b   :  { %268 = vmatpush.bf16.msra.mxu0 %v590_v15  ;;  %611 = vmatpush.bf16.msra.mxu2 %v590_v15 }
  0x1e   :  { %317 = vmatpush.bf16.msra.mxu1 %v598_v16  ;;  %619 = vmatpush.bf16.msra.mxu3 %v598_v16 }
  0x1f   :  { %269 = vmatpush.bf16.msra.mxu0 %v589_v17  ;;  %612 = vmatpush.bf16.msra.mxu2 %v589_v17 }
  0x22   :  { %318 = vmatpush.bf16.msra.mxu1 %v597_v22  ;;  %620 = vmatpush.bf16.msra.mxu3 %v597_v22 }
  0x23   :  { %270 = vmatmul.bf16.vlgmr.msra.gmra.mxu0 %v440_v27  ;;  %290 = vmatmul.bf16.vlgmr.msra.gmra.mxu2 %v472_v28 }
  0x25   :  { %565 = vmatmul.msk.bf16.vlgmr.msra.gmra.mxu1 %vm233_vm1, %v444_v29  ;;  %569 = vmatmul.msk.bf16.vlgmr.msra.gmra.mxu3 %vm233_vm1, %v476_v30 }
  0x33   :  { %275 = vmatmul.bf16.gmra.mxu0 %v448_v39  ;;  %295 = vmatmul.bf16.gmra.mxu2 %v480_v40 }
  0x35   :  { %566 = vmatmul.msk.bf16.gmra.mxu1 %vm233_vm1, %v452_v41  ;;  %570 = vmatmul.msk.bf16.gmra.mxu3 %vm233_vm1, %v484_v42 }
  0x43   :  { %280 = vmatmul.bf16.gmra.mxu0 %v456_v51  ;;  %300 = vmatmul.bf16.gmra.mxu2 %v488_v52 }
  0x45   :  { %567 = vmatmul.msk.bf16.gmra.mxu1 %vm233_vm1, %v460_v53  ;;  %571 = vmatmul.msk.bf16.gmra.mxu3 %vm233_vm1, %v492_v54 }
  0x53   :  { %285 = vmatmul.bf16.gmra.mxu0 %v464_v63  ;;  %305 = vmatmul.bf16.gmra.mxu2 %v496_v0 }
  0x55   :  { %568 = vmatmul.msk.bf16.gmra.mxu1 %vm233_vm1, %v468_v1  ;;  %572 = vmatmul.msk.bf16.gmra.mxu3 %vm233_vm1, %v500_v2 }
  0xa0   :  { %v271_v4 = vpop.f32.mrf.mxu0 }
  0xa1   :  { %v272_v5 = vadd.f32 %v800_v3, %v271_v4 }
  0xa2   :  { %v320_v6 = vpop.f32.mrf.mxu1 }
  0xa3   :  { %v321_v7 = vadd.f32 %v320_v6, %v272_v5 }
  0xa5   :  { %361 = vst.msk [vmem:[#allocation2] sm:$0xff] %vm360_vm2, %v321_v7 }
  0xa6   :  { %v291_v8 = vpop.f32.mrf.mxu2 }
  0xa7   :  { %v292_v9 = vadd.f32 %v800_v3, %v291_v8 }
  0xa8   :  { %v340_v10 = vpop.f32.mrf.mxu3  ;;  %v273_v11 = vpop.f32.mrf.mxu0 }
  0xa9   :  { %v341_v12 = vadd.f32 %v340_v10, %v292_v9  ;;  %v274_v13 = vadd.f32 %v800_v3, %v273_v11 }
  0xaa   :  { %v322_v14 = vpop.f32.mrf.mxu1 }
  0xab   :  { %369 = vst.msk [vmem:[#allocation2 + $0x40] sm:$0xff] %vm360_vm2, %v341_v12  ;;  %v323_v15 = vadd.f32 %v322_v14, %v274_v13 }
  0xad   :  { %362 = vst.msk [vmem:[#allocation2 + $0x8] sm:$0xff] %vm360_vm2, %v323_v15 }
  0xae   :  { %v293_v16 = vpop.f32.mrf.mxu2 }
  0xaf   :  { %v294_v17 = vadd.f32 %v800_v3, %v293_v16 }
  0xb0   :  { %v342_v18 = vpop.f32.mrf.mxu3  ;;  %v276_v19 = vpop.f32.mrf.mxu0 }
  0xb1   :  { %v343_v20 = vadd.f32 %v342_v18, %v294_v17  ;;  %v277_v21 = vadd.f32 %v800_v3, %v276_v19 }
  0xb2   :  { %v325_v22 = vpop.f32.mrf.mxu1 }
  0xb3   :  { %370 = vst.msk [vmem:[#allocation2 + $0x48] sm:$0xff] %vm360_vm2, %v343_v20  ;;  %v326_v23 = vadd.f32 %v325_v22, %v277_v21 }
  0xb5   :  { %363 = vst.msk [vmem:[#allocation2 + $0x10] sm:$0xff] %vm360_vm2, %v326_v23 }
  0xb6   :  { %v296_v24 = vpop.f32.mrf.mxu2 }
  0xb7   :  { %v297_v25 = vadd.f32 %v800_v3, %v296_v24 }
  0xb8   :  { %v345_v26 = vpop.f32.mrf.mxu3  ;;  %v278_v27 = vpop.f32.mrf.mxu0 }
  0xb9   :  { %v346_v28 = vadd.f32 %v345_v26, %v297_v25  ;;  %v279_v29 = vadd.f32 %v800_v3, %v278_v27 }
  0xba   :  { %v327_v30 = vpop.f32.mrf.mxu1 }
  0xbb   :  { %371 = vst.msk [vmem:[#allocation2 + $0x50] sm:$0xff] %vm360_vm2, %v346_v28  ;;  %v328_v31 = vadd.f32 %v327_v30, %v279_v29 }
  0xbd   :  { %364 = vst.msk [vmem:[#allocation2 + $0x18] sm:$0xff] %vm360_vm2, %v328_v31 }
  0xbe   :  { %v298_v32 = vpop.f32.mrf.mxu2 }
  0xbf   :  { %v299_v33 = vadd.f32 %v800_v3, %v298_v32 }
  0xc0   :  { %v347_v34 = vpop.f32.mrf.mxu3  ;;  %v281_v35 = vpop.f32.mrf.mxu0 }
  0xc1   :  { %v348_v36 = vadd.f32 %v347_v34, %v299_v33  ;;  %v282_v37 = vadd.f32 %v800_v3, %v281_v35 }
  0xc2   :  { %v330_v38 = vpop.f32.mrf.mxu1 }
  0xc3   :  { %372 = vst.msk [vmem:[#allocation2 + $0x58] sm:$0xff] %vm360_vm2, %v348_v36  ;;  %v331_v39 = vadd.f32 %v330_v38, %v282_v37 }
  0xc4   :  { %v377_v40 = vld [vmem:[#allocation2] ss:$4 sm:$0xff]  ;;  %v385_v41 = vld [vmem:[#allocation2 + $0x1] ss:$4 sm:$0xff]  ;;  %v393_v42 = vld [vmem:[#allocation2 + $0x2] ss:$4 sm:$0xff] }
  0xc5   :  { %v401_v43 = vld [vmem:[#allocation2 + $0x3] ss:$4 sm:$0xff]  ;;  %v408_v44 = vmax.f32 %v377_v40, %v385_v41  ;;  %365 = vst.msk [vmem:[#allocation2 + $0x20] sm:$0xff] %vm360_vm2, %v331_v39 }
  0xc6   :  { %v412_v45 = vmax.f32 %v393_v42, %v401_v43  ;;  %v301_v46 = vpop.f32.mrf.mxu2 }
  0xc7   :  { %v302_v47 = vadd.f32 %v800_v3, %v301_v46 }
  0xc8   :  { %v416_v48 = vmax.f32 %v408_v44, %v412_v45  ;;  %v350_v49 = vpop.f32.mrf.mxu3  ;;  %v283_v50 = vpop.f32.mrf.mxu0 }
  0xc9   :  { %v351_v51 = vadd.f32 %v350_v49, %v302_v47  ;;  %v284_v52 = vadd.f32 %v800_v3, %v283_v50 }
  0xca   :  { %v420_v53 = vmax.f32 %v416_v48, 0.0  ;;  %v381_v54 = vld [vmem:[#allocation2 + $0x40] ss:$4 sm:$0xff]  ;;  %v389_v55 = vld [vmem:[#allocation2 + $0x41] ss:$4 sm:$0xff]  ;;  %v332_v56 = vpop.f32.mrf.mxu1 }
  0xcb   :  { %v397_v57 = vld [vmem:[#allocation2 + $0x42] ss:$4 sm:$0xff]  ;;  %v405_v58 = vld [vmem:[#allocation2 + $0x43] ss:$4 sm:$0xff]  ;;  %v410_v59 = vmax.f32 %v381_v54, %v389_v55  ;;  %373 = vst.msk [vmem:[#allocation2 + $0x60] sm:$0xff] %vm360_vm2, %v351_v51  ;;  %v333_v60 = vadd.f32 %v332_v56, %v284_v52 }
  0xcc   :  { %v424_v61 = vpack.c.bf16 %v420_v53, %v420_v53  ;;  %v414_v62 = vmax.f32 %v397_v57, %v405_v58 }
  0xcd   :  { %366 = vst.msk [vmem:[#allocation2 + $0x28] sm:$0xff] %vm360_vm2, %v333_v60 }
  0xce   :  { %429 = vst.msk [vmem:[%s853_s3] sm:$0xf] %vm428_vm3, %v424_v61  ;;  %v418_v63 = vmax.f32 %v410_v59, %v414_v62  ;;  %v303_v0 = vpop.f32.mrf.mxu2 }
  0xcf   :  { %v304_v1 = vadd.f32 %v800_v3, %v303_v0 }
  0xd0   :  { %v422_v2 = vmax.f32 %v418_v63, 0.0  ;;  %v352_v4 = vpop.f32.mrf.mxu3  ;;  %v286_v5 = vpop.f32.mrf.mxu0 }
  0xd1   :  { %v353_v6 = vadd.f32 %v352_v4, %v304_v1  ;;  %v287_v7 = vadd.f32 %v800_v3, %v286_v5 }
  0xd2   :  { %v426_v8 = vpack.c.bf16 %v422_v2, %v422_v2  ;;  %v335_v9 = vpop.f32.mrf.mxu1 }
  0xd3   :  { %374 = vst.msk [vmem:[#allocation2 + $0x68] sm:$0xff] %vm360_vm2, %v353_v6  ;;  %v336_v10 = vadd.f32 %v335_v9, %v287_v7 }
  0xd4   :  { %431 = vst.msk [vmem:[%s853_s3 + $0x8] sm:$0xf] %vm428_vm3, %v426_v8 }
  0xd5   :  { %367 = vst.msk [vmem:[#allocation2 + $0x30] sm:$0xff] %vm360_vm2, %v336_v10 }
  0xd6   :  { %v306_v11 = vpop.f32.mrf.mxu2 }
  0xd7   :  { %v307_v12 = vadd.f32 %v800_v3, %v306_v11 }
  0xd8   :  { %v355_v13 = vpop.f32.mrf.mxu3  ;;  %v288_v14 = vpop.f32.mrf.mxu0 }
  0xd9   :  { %v356_v15 = vadd.f32 %v355_v13, %v307_v12  ;;  %v289_v16 = vadd.f32 %v800_v3, %v288_v14 }
  0xda   :  { %v337_v17 = vpop.f32.mrf.mxu1 }
  0xdb   :  { %375 = vst.msk [vmem:[#allocation2 + $0x70] sm:$0xff] %vm360_vm2, %v356_v15  ;;  %v338_v18 = vadd.f32 %v337_v17, %v289_v16 }
  0xdd   :  { %368 = vst.msk [vmem:[#allocation2 + $0x38] sm:$0xff] %vm360_vm2, %v338_v18 }
  0xde   :  { %v308_v19 = vpop.f32.mrf.mxu2 }
  0xdf   :  { %v309_v20 = vadd.f32 %v800_v3, %v308_v19 }
  0xe0   :  { %v357_v21 = vpop.f32.mrf.mxu3 }
  0xe1   :  { %v358_v22 = vadd.f32 %v357_v21, %v309_v20 }
  0xe3   :  { %376 = vst.msk [vmem:[#allocation2 + $0x78] sm:$0xff] %vm360_vm2, %v358_v22 }
  0xe4   :  { %v379_v23 = vld [vmem:[#allocation2 + $0x20] ss:$4 sm:$0xff]  ;;  %v387_v24 = vld [vmem:[#allocation2 + $0x21] ss:$4 sm:$0xff]  ;;  %v395_v25 = vld [vmem:[#allocation2 + $0x22] ss:$4 sm:$0xff] }
  0xe5   :  { %v403_v26 = vld [vmem:[#allocation2 + $0x23] ss:$4 sm:$0xff]  ;;  %v409_v27 = vmax.f32 %v379_v23, %v387_v24 }
  0xe6   :  { %v413_v28 = vmax.f32 %v395_v25, %v403_v26 }
  0xe8   :  { %v417_v29 = vmax.f32 %v409_v27, %v413_v28 }
  0xea   :  { %v421_v30 = vmax.f32 %v417_v29, 0.0  ;;  %v383_v31 = vld [vmem:[#allocation2 + $0x60] ss:$4 sm:$0xff]  ;;  %v391_v32 = vld [vmem:[#allocation2 + $0x61] ss:$4 sm:$0xff] }
  0xeb   :  { %v399_v33 = vld [vmem:[#allocation2 + $0x62] ss:$4 sm:$0xff]  ;;  %v407_v34 = vld [vmem:[#allocation2 + $0x63] ss:$4 sm:$0xff]  ;;  %v411_v35 = vmax.f32 %v383_v31, %v391_v32 }
  0xec   :  { %v425_v36 = vpack.c.bf16 %v421_v30, %v421_v30  ;;  %v415_v37 = vmax.f32 %v399_v33, %v407_v34 }
  0xee   :  { %430 = vst.msk [vmem:[%s853_s3 + $0x4] sm:$0xf] %vm428_vm3, %v425_v36  ;;  %v419_v3 = vmax.f32 %v411_v35, %v415_v37 }
  0xf0   :  { %v423_v38 = vmax.f32 %v419_v3, 0.0 }
  0xf2   :  { %v427_v39 = vpack.c.bf16 %v423_v38, %v423_v38 }
  0xf4   :  { %432 = vst.msk [vmem:[%s853_s3 + $0xc] sm:$0xf] %vm428_vm3, %v427_v39 }

// kernel: net_forward.5
= control target key start
LH: loop header
LB: loop body
LE: loop exit
PB: predicated region body
PF: predicated region fallthrough
CT: control target
= control target key end

     0   :  { %s589_s0 = inlined_call_operand.vmem [shape: bf16[2,320], index: 0, kind: input, shape index: {}]   ;;  %s590_s1 = inlined_call_operand.vmem [shape: bf16[320,50], index: 1, kind: input, shape index: {}]   ;;  %s591_s2 = inlined_call_operand.vmem [shape: f32[1,50], index: 2, kind: input, shape index: {}]   ;;  %s592_s3 = inlined_call_operand.vmem [shape: bf16[50,10], index: 3, kind: input, shape index: {}]   ;;  %s593_s4 = inlined_call_operand.vmem [shape: f32[1,10], index: 4, kind: input, shape index: {}]   ;;  %s594_s5 = inlined_call_operand.hbm [shape: f32[2,10], index: 5, kind: output, shape index: {}]  }
   0x1   :  { %v422_v0 = vld [vmem:[%s590_s1 + $0x38] sm:$0xff]  ;;  %v421_v3 = vld [vmem:[%s590_s1 + $0x30] sm:$0xff]  ;;  %v22_v6 = vld [vmem:[%s589_s0] sm:$0x7] }
   0x2   :  { %v430_v1 = vld [vmem:[%s590_s1 + $0x78] sm:$0xff]  ;;  %197 = vmatpush.bf16.msra.mxu0 %v422_v0  ;;  %v429_v4 = vld [vmem:[%s590_s1 + $0x70] sm:$0xff]  ;;  %v420_v7 = vld [vmem:[%s590_s1 + $0x28] sm:$0xff]  ;;  %68 = vst [vmem:[#allocation1] ss:$9 sm:$0xff] %v22_v6 }
   0x3   :  { %v434_v2 = vld [vmem:[%s590_s1 + $0x98] sm:$0xff]  ;;  %210 = vmatpush.bf16.msra.mxu1 %v430_v1  ;;  %v433_v5 = vld [vmem:[%s590_s1 + $0x90] sm:$0xff]  ;;  %v428_v8 = vld [vmem:[%s590_s1 + $0x68] sm:$0xff] }
   0x4   :  { %227 = vmatpush.bf16.msra.mxu2 %v434_v2  ;;  %v432_v9 = vld [vmem:[%s590_s1 + $0x88] sm:$0xff] }
   0x6   :  { %198 = vmatpush.bf16.msra.mxu0 %v421_v3 }
   0x7   :  { %211 = vmatpush.bf16.msra.mxu1 %v429_v4 }
   0x8   :  { %228 = vmatpush.bf16.msra.mxu2 %v433_v5 }
   0x9   :  { %10 = vsyncpa [#allocation3], 0  ;;  %v419_v10 = vld [vmem:[%s590_s1 + $0x20] sm:$0xff]  ;;  %v418_v13 = vld [vmem:[%s590_s1 + $0x18] sm:$0xff]  ;;  %vm194_vm0 = vcmask 523264   ;;  %vm274_vm1 = vcmask 1040384  }
   0xa   :  { %199 = vmatpush.bf16.msra.mxu0 %v420_v7  ;;  %v427_v11 = vld [vmem:[%s590_s1 + $0x60] sm:$0xff]  ;;  %v426_v14 = vld [vmem:[%s590_s1 + $0x58] sm:$0xff]  ;;  %v417_v16 = vld [vmem:[%s590_s1 + $0x10] sm:$0xff]  ;;  %vm270_vm2 = vcmask 408576   ;;  %vm291_vm3 = vcmask 74752   ;;  %s312_s20 = sshll.u32 %s594_s5, 4  ;;  %s313_s20 = int_to_ptr.hbm [resolvable:$true] %s312_s20 }
   0xb   :  { %212 = vmatpush.bf16.msra.mxu1 %v428_v8  ;;  %v431_v12 = vld [vmem:[%s590_s1 + $0x80] sm:$0xff]  ;;  %v71_v15 = vld [vmem:[#allocation1 + $0x12] sm:$0xff]  ;;  %v416_v18 = vld [vmem:[%s590_s1 + $0x8] sm:$0xff] }
   0xc   :  { %229 = vmatpush.bf16.msra.mxu2 %v432_v9  ;;  %v425_v17 = vld [vmem:[%s590_s1 + $0x50] sm:$0xff]  ;;  %v424_v19 = vld [vmem:[%s590_s1 + $0x48] sm:$0xff]  ;;  %v415_v20 = vld [vmem:[%s590_s1] sm:$0xff] }
   0xd   :  { %v423_v21 = vld [vmem:[%s590_s1 + $0x40] sm:$0xff]  ;;  %v70_v23 = vld [vmem:[#allocation1 + $0x9] sm:$0xff]  ;;  %v244_v24 = vld [vmem:[%s592_s3 + $0x18] sm:$0x1] }
   0xe   :  { %200 = vmatpush.bf16.msra.mxu0 %v419_v10  ;;  %v69_v22 = vld [vmem:[#allocation1] sm:$0xff]  ;;  %v262_v25 = vunpack.c.l.b16 %v244_v24  ;;  %v437_v28 = vld [vmem:[%s592_s3 + $0x10] sm:$0xff]  ;;  %v436_v29 = vld [vmem:[%s592_s3 + $0x8] sm:$0xff] }
   0xf   :  { %213 = vmatpush.bf16.msra.mxu1 %v427_v11  ;;  %v435_v30 = vld [vmem:[%s592_s3] sm:$0xff] }
  0x10   :  { %230 = vmatpush.bf16.msra.mxu2 %v431_v12  ;;  %v266_v26 = vpack.c.b16 %v262_v25, %v262_v25  ;;  %v439_v32 = vld [vmem:[%s591_s2] ss:$0 sm:$0xff]  ;;  %s471_s2 = smov [#allocation2]  }
  0x11   :  { %v440_v43 = vld [vmem:[%s593_s4] ss:$0 sm:$0xff]  ;;  %s310_s4 = sshll.u32 %s471_s2, 4  ;;  %s311_s4 = int_to_ptr.vmem [resolvable:$true] %s310_s4 }
  0x12   :  { %201 = vmatpush.bf16.msra.mxu0 %v418_v13  ;;  %v276_v27 = vsel %vm274_vm1, %v266_v26, 0 }
  0x13   :  { %214 = vmatpush.bf16.msra.mxu1 %v426_v14  ;;  %401 = vmatmul.msk.bf16.vlgmr.msra.gmra.mxu2 %vm194_vm0, %v71_v15 }
  0x14   :  { %282 = vmatpush.bf16.msra.mxu3 %v276_v27 }
  0x16   :  { %202 = vmatpush.bf16.msra.mxu0 %v417_v16 }
  0x17   :  { %215 = vmatpush.bf16.msra.mxu1 %v425_v17 }
  0x18   :  { %283 = vmatpush.bf16.msra.mxu3 %v437_v28 }
  0x1a   :  { %203 = vmatpush.bf16.msra.mxu0 %v416_v18 }
  0x1b   :  { %216 = vmatpush.bf16.msra.mxu1 %v424_v19 }
  0x1c   :  { %284 = vmatpush.bf16.msra.mxu3 %v436_v29 }
  0x1e   :  { %204 = vmatpush.bf16.msra.mxu0 %v415_v20 }
  0x1f   :  { %217 = vmatpush.bf16.msra.mxu1 %v423_v21 }
  0x20   :  { %285 = vmatpush.bf16.msra.mxu3 %v435_v30 }
  0x21   :  { %205 = vmatmul.bf16.vlgmr.msra.gmra.mxu0 %v69_v22 }
  0x22   :  { %218 = vmatmul.bf16.vlgmr.msra.gmra.mxu1 %v70_v23 }
  0x96   :  { %v232_v31 = vpop.f32.mrf.mxu2 }
  0x9e   :  { %v206_v33 = vpop.f32.mrf.mxu0  ;;  %v234_v36 = vpop.f32.mrf.mxu2 }
  0x9f   :  { %v219_v34 = vpop.f32.mrf.mxu1  ;;  %v207_v35 = vadd.f32 %v439_v32, %v206_v33 }
  0xa1   :  { %v220_v37 = vadd.f32 %v219_v34, %v207_v35 }
  0xa3   :  { %v233_v38 = vadd.f32 %v232_v31, %v220_v37 }
  0xa5   :  { %v236_v39 = vmax.f32 %v233_v38, 0.0 }
  0xa6   :  { %v208_v40 = vpop.f32.mrf.mxu0 }
  0xa7   :  { %v221_v41 = vpop.f32.mrf.mxu1  ;;  %v237_v42 = vpack.c.bf16 %v236_v39, %v236_v39 }
  0xa9   :  { %414 = vmatmul.msk.bf16.vlgmr.msra.gmra.mxu3 %vm270_vm2, %v237_v42 }
 0x12c   :  { %v287_v44 = vpop.f32.mrf.mxu3 }
 0x12d   :  { %v288_v45 = vadd.f32 %v440_v43, %v287_v44 }
 0x12f   :  { %v292_v46 = vsel %vm291_vm3, %v288_v45, -inf }
 0x130   :  { %293 = vmax.xlane.f32.xlu0 %v292_v46 }
 0x134   :  { %v289_v47 = vpop.f32.mrf.mxu3 }
 0x1a3   :  { %v294_v48 = vpop.xlane.xlu0 %293 }
 0x1a4   :  { %v295_v49 = vsub.f32 %v288_v45, %v294_v48 }
 0x1a6   :  { %v296_v50 = vmul.f32 1.442695, %v295_v49 }
 0x1a8   :  { %441 = vpow2.f32 %v296_v50 }
 0x1ae   :  { %v442_v51 = vpop.eup %441 }
 0x1af   :  { %v298_v52 = vsel %vm291_vm3, %v442_v51, 0.0 }
 0x1b0   :  { %299 = vadd.xlane.f32.xlu0 %v298_v52 }
 0x223   :  { %v300_v53 = vpop.xlane.xlu0 %299 }
 0x224   :  { %443 = vlog2.f32 %v300_v53 }
 0x22a   :  { %v444_v54 = vpop.eup %443 }
 0x22b   :  { %v302_v55 = vmul.f32 0.6931472, %v444_v54 }
 0x22d   :  { %v303_v56 = vsub.f32 %v295_v49, %v302_v55 }
 0x22f   :  { %304 = vst.msk [vmem:[#allocation2] sm:$0x3] %vm291_vm3, %v303_v56 }
 0x230   :  { %315 = dma.vmem_to_hbm [thread:$0]  %s311_s4, 32, %s313_s20, [#allocation3]  }
 0x231   :  { %469 = dma.done.wait [#allocation3], 32  }
 0x232   :  { %470 = vsyncadd [#allocation3], 4294967264 }
 0x233   :  { %320 = vsyncpa [#allocation3], 1 }

</bundles_post_ra>
